<compile_context>
chip_gen: v6e
topology: v6e:2x2x1
jax: 0.10.0
libtpu: 0.0.40
codegen_flags: <defaults>
</compile_context>

<pallas_src>
import jax
import jax.numpy as jnp
from jax.experimental import pallas as pl
from jax.experimental.pallas import tpu as pltpu


def _round_up(n, m):
    return (n + m - 1) // m * m


# ----------------------------------------------------------------------------
# Kernel
# ----------------------------------------------------------------------------
def fcnn_kernel(x_ref, w1_ref, b1_ref, w2_ref, b2_ref, w3_ref, b3_ref, out_ref):
    # Cast the f32 activations to bf16 in-register (no extra HBM pass); all
    # matmuls run on the MXU in bf16 with f32 accumulation, bias/ReLU in f32.
    x = x_ref[...].astype(jnp.bfloat16)

    # fc1 + relu
    h1 = jnp.dot(x, w1_ref[...], preferred_element_type=jnp.float32)
    h1 = jnp.maximum(h1 + b1_ref[...], 0.0).astype(jnp.bfloat16)

    # fc2 + relu
    h2 = jnp.dot(h1, w2_ref[...], preferred_element_type=jnp.float32)
    h2 = jnp.maximum(h2 + b2_ref[...], 0.0).astype(jnp.bfloat16)

    # fc3 (logits, no activation).  w3/b3 are zero-padded to 128 lanes so the
    # store is unmasked / lane-dense.
    logits = jnp.dot(h2, w3_ref[...], preferred_element_type=jnp.float32)
    out_ref[...] = (logits + b3_ref[...]).astype(out_ref.dtype)


# ----------------------------------------------------------------------------
# One-time parameter preparation (hoisted out of the per-call path)
# ----------------------------------------------------------------------------
def prepare_params(params):
    """Casts weights to bf16, biases to f32 row vectors, and zero-pads the
    logits dimension to a lane-dense 128.  Call once; reuse across forwards."""
    w1, b1, w2, b2, w3, b3 = params
    H2, C = w3.shape
    C_pad = _round_up(C, 128)  # 10 -> 128

    bf = jnp.bfloat16
    w3_p = jnp.zeros((H2, C_pad), bf).at[:, :C].set(w3.astype(bf))
    b3_p = jnp.zeros((1, C_pad), jnp.float32).at[:, :C].set(
        jnp.asarray(b3, jnp.float32).reshape(1, C)
    )
    return {
        "w1": w1.astype(bf),
        "b1": jnp.asarray(b1, jnp.float32).reshape(1, -1),
        "w2": w2.astype(bf),
        "b2": jnp.asarray(b2, jnp.float32).reshape(1, -1),
        "w3": w3_p,
        "b3": b3_p,
        "num_classes": int(C),
    }


# ----------------------------------------------------------------------------
# pallas_call wrapper
# ----------------------------------------------------------------------------
def _run_pallas(x_in, prepared, TM, n_tiles, single_buffer_weights):
    w1, b1 = prepared["w1"], prepared["b1"]
    w2, b2 = prepared["w2"], prepared["b2"]
    w3, b3 = prepared["w3"], prepared["b3"]

    B_pad, K = x_in.shape           # K = 784 (full-extent last dim, no padding)
    H1 = w1.shape[1]                # 512
    H2 = w2.shape[1]                # 256
    C_pad = w3.shape[1]             # 128 (lane-dense logits)

    def const(shape):
        # Constant block index => weights/biases stay resident in VMEM across
        # all batch-tile grid steps (no re-DMA).  Their block never changes,
        # so a single buffer suffices (saves ~1.2 MB of VMEM).
        kwargs = {}
        if single_buffer_weights and hasattr(pl, "Buffered"):
            kwargs["pipeline_mode"] = pl.Buffered(1)
        return pl.BlockSpec(shape, lambda i: tuple(0 for _ in shape), **kwargs)

    return pl.pallas_call(
        fcnn_kernel,
        out_shape=jax.ShapeDtypeStruct((B_pad, C_pad), jnp.float32),
        grid_spec=pltpu.PrefetchScalarGridSpec(
            num_scalar_prefetch=0,
            grid=(n_tiles,),
            in_specs=[
                # x tiles pipeline (double-buffered DMA) over the batch grid.
                pl.BlockSpec((TM, K), lambda i: (i, 0)),
                const((K, H1)), const((1, H1)),
                const((H1, H2)), const((1, H2)),
                const((H2, C_pad)), const((1, C_pad)),
            ],
            out_specs=pl.BlockSpec((TM, C_pad), lambda i: (i, 0)),
        ),
        compiler_params=pltpu.CompilerParams(
            # Batch axis is embarrassingly parallel; on v7x this lets the two
            # TensorCores each take batch tiles.  If profiling ever shows
            # single-core occupancy, switch to pltpu.CORE_PARALLEL here.
            dimension_semantics=("parallel",),
            # Headroom for the f32 h1/h2 intermediates at large TM (safe on
            # all generations: well under physical VMEM, above v5e's default).
            vmem_limit_bytes=48 * 1024 * 1024,
        ),
    )(x_in, w1, b1, w2, b2, w3, b3)


def fcnn_forward(x, prepared, *, tm_max=1024):
    """x: [B, 1, 28, 28] or [B, 784] float32.  `prepared` = prepare_params(...).
    Returns [B, num_classes] f32 logits."""
    B = x.shape[0]
    x2d = x.reshape(B, -1).astype(jnp.float32)   # nn.Flatten (no copy of note)
    num_classes = prepared["num_classes"]

    # ---- batch tiling -------------------------------------------------------
    B8 = _round_up(B, 8)
    TM = min(tm_max, B8)
    # v7x megacore: ensure >= 2 batch tiles when the batch allows splitting,
    # so both TensorCores get work (harmless on single-TC v5e/v6e).
    if B8 >= 16 and B8 // TM < 2:
        TM = _round_up(B8 // 2, 8)
    n_tiles = (B8 + TM - 1) // TM
    B_pad = n_tiles * TM

    # Pad the batch only when actually required (no-op for multiples of TM).
    if B_pad != B:
        x_in = jnp.zeros((B_pad, x2d.shape[1]), x2d.dtype).at[:B].set(x2d)
    else:
        x_in = x2d

    try:
        out = _run_pallas(x_in, prepared, TM, n_tiles, single_buffer_weights=True)
    except Exception:
        # Fallback if this JAX build rejects pipeline_mode=pl.Buffered(1) on
        # the resident weight blocks (correctness-identical, slightly more VMEM).
        out = _run_pallas(x_in, prepared, TM, n_tiles, single_buffer_weights=False)

    return out[:B, :num_classes]


# ----------------------------------------------------------------------------
# Params / references
# ----------------------------------------------------------------------------
def init_params(key, input_size=784, hidden1=512, hidden2=256, num_classes=10):
    """Deterministic init mimicking nn.Linear's U(-1/sqrt(fan_in), 1/sqrt(fan_in)).
    Weights are [in, out] (kernel computes x @ W + b)."""
    ks = jax.random.split(key, 6)

    def linear(kw, kb, fan_in, fan_out):
        bound = 1.0 / jnp.sqrt(jnp.float32(fan_in))
        w = jax.random.uniform(kw, (fan_in, fan_out), jnp.float32, -bound, bound)
        b = jax.random.uniform(kb, (1, fan_out), jnp.float32, -bound, bound)
        return w, b

    w1, b1 = linear(ks[0], ks[1], input_size, hidden1)
    w2, b2 = linear(ks[2], ks[3], hidden1, hidden2)
    w3, b3 = linear(ks[4], ks[5], hidden2, num_classes)
    return (w1, b1, w2, b2, w3, b3)


def fcnn_ref_f32(x, params):
    """Pure-JAX f32 reference (exact PyTorch forward semantics)."""
    w1, b1, w2, b2, w3, b3 = params
    h = x.reshape(x.shape[0], -1)
    h = jnp.maximum(h @ w1 + b1, 0.0)
    h = jnp.maximum(h @ w2 + b2, 0.0)
    return h @ w3 + b3


def fcnn_ref_bf16(x, params):
    """Pure-JAX reference with the same bf16 matmul / f32 accumulate recipe."""
    w1, b1, w2, b2, w3, b3 = params
    bf = jnp.bfloat16
    h = x.reshape(x.shape[0], -1).astype(bf)
    h = jnp.maximum(
        jnp.dot(h, w1.astype(bf), preferred_element_type=jnp.float32) + b1, 0.0
    ).astype(bf)
    h = jnp.maximum(
        jnp.dot(h, w2.astype(bf), preferred_element_type=jnp.float32) + b2, 0.0
    ).astype(bf)
    return jnp.dot(h, w3.astype(bf), preferred_element_type=jnp.float32) + b3


if __name__ == "__main__":
    key = jax.random.PRNGKey(0)
    k_param, k_x = jax.random.split(key)

    params = init_params(k_param)
    prepared = prepare_params(params)          # one-time; reused across calls
    x = jax.random.normal(k_x, (8, 1, 28, 28), dtype=jnp.float32)  # MNIST-shaped batch

    out = fcnn_forward(x, prepared)
    out = jax.block_until_ready(out)

    assert out.shape == (8, 10), out.shape

    # Tight check against an identical bf16-compute reference.
    ref_bf16 = fcnn_ref_bf16(x, params)
    err_bf16 = float(jnp.max(jnp.abs(out - ref_bf16)))
    assert err_bf16 < 2e-2, err_bf16

    # Loose check against the exact f32 PyTorch-equivalent forward.
    ref_f32 = fcnn_ref_f32(x, params)
    err_f32 = float(jnp.max(jnp.abs(out - ref_f32)))
    assert err_f32 < 5e-2, err_f32

    print("KERNEL_OK")
</pallas_src>

<mosaic_0001>
module attributes {stable_mosaic.version = 11 : i64} {
  func.func @fcnn_kernel(%arg0: i32, %arg1: memref<8x784xf32, #tpu.memory_space<vmem>>, %arg2: memref<784x512xbf16, #tpu.memory_space<vmem>>, %arg3: memref<1x512xf32, #tpu.memory_space<vmem>>, %arg4: memref<512x256xbf16, #tpu.memory_space<vmem>>, %arg5: memref<1x256xf32, #tpu.memory_space<vmem>>, %arg6: memref<256x128xbf16, #tpu.memory_space<vmem>>, %arg7: memref<1x128xf32, #tpu.memory_space<vmem>>, %arg8: memref<8x128xf32, #tpu.memory_space<vmem>>) attributes {dimension_semantics = [#tpu.dimension_semantics<parallel>], iteration_bounds = array<i64: 1>, scalar_prefetch = 0 : i64, scratch_operands = 0 : i64, tpu.core_type = #tpu.core_type<tc>, window_params = [{transform_indices = @transform_0, window_bounds = array<i64: 8, 784>}, {pipeline_mode = #tpu.pipeline_mode<synchronous>, transform_indices = @transform_1, window_bounds = array<i64: 784, 512>}, {pipeline_mode = #tpu.pipeline_mode<synchronous>, transform_indices = @transform_2, window_bounds = array<i64: 1, 512>}, {pipeline_mode = #tpu.pipeline_mode<synchronous>, transform_indices = @transform_3, window_bounds = array<i64: 512, 256>}, {pipeline_mode = #tpu.pipeline_mode<synchronous>, transform_indices = @transform_4, window_bounds = array<i64: 1, 256>}, {pipeline_mode = #tpu.pipeline_mode<synchronous>, transform_indices = @transform_5, window_bounds = array<i64: 256, 128>}, {pipeline_mode = #tpu.pipeline_mode<synchronous>, transform_indices = @transform_6, window_bounds = array<i64: 1, 128>}, {transform_indices = @transform_7, window_bounds = array<i64: 8, 128>}]} {
    %c0 = arith.constant 0 : index
    %c0_0 = arith.constant 0 : index
    %0 = vector.load %arg1[%c0, %c0_0] : memref<8x784xf32, #tpu.memory_space<vmem>>, vector<8x784xf32>
    %1 = arith.truncf %0 : vector<8x784xf32> to vector<8x784xbf16>
    %c0_1 = arith.constant 0 : index
    %c0_2 = arith.constant 0 : index
    %2 = vector.load %arg2[%c0_1, %c0_2] : memref<784x512xbf16, #tpu.memory_space<vmem>>, vector<784x512xbf16>
    %cst = arith.constant dense<0.000000e+00> : vector<8x512xf32>
    %3 = tpu.matmul %1, %2, %cst {dimension_numbers = #tpu.dot_dimension_numbers<[1], [0], [0], [1], [0, 0, 1, 1], [], []>} : vector<8x784xbf16>, vector<784x512xbf16>, vector<8x512xf32> -> vector<8x512xf32>
    %c0_3 = arith.constant 0 : index
    %c0_4 = arith.constant 0 : index
    %4 = vector.load %arg3[%c0_3, %c0_4] : memref<1x512xf32, #tpu.memory_space<vmem>>, vector<1x512xf32>
    %5 = vector.broadcast %4 : vector<1x512xf32> to vector<8x512xf32>
    %6 = arith.addf %3, %5 : vector<8x512xf32>
    %cst_5 = arith.constant 0.000000e+00 : f32
    %7 = vector.broadcast %cst_5 : f32 to vector<8x512xf32>
    %8 = arith.maximumf %6, %7 : vector<8x512xf32>
    %9 = arith.truncf %8 : vector<8x512xf32> to vector<8x512xbf16>
    %c0_6 = arith.constant 0 : index
    %c0_7 = arith.constant 0 : index
    %10 = vector.load %arg4[%c0_6, %c0_7] : memref<512x256xbf16, #tpu.memory_space<vmem>>, vector<512x256xbf16>
    %cst_8 = arith.constant dense<0.000000e+00> : vector<8x256xf32>
    %11 = tpu.matmul %9, %10, %cst_8 {dimension_numbers = #tpu.dot_dimension_numbers<[1], [0], [0], [1], [0, 0, 1, 1], [], []>} : vector<8x512xbf16>, vector<512x256xbf16>, vector<8x256xf32> -> vector<8x256xf32>
    %c0_9 = arith.constant 0 : index
    %c0_10 = arith.constant 0 : index
    %12 = vector.load %arg5[%c0_9, %c0_10] : memref<1x256xf32, #tpu.memory_space<vmem>>, vector<1x256xf32>
    %13 = vector.broadcast %12 : vector<1x256xf32> to vector<8x256xf32>
    %14 = arith.addf %11, %13 : vector<8x256xf32>
    %cst_11 = arith.constant 0.000000e+00 : f32
    %15 = vector.broadcast %cst_11 : f32 to vector<8x256xf32>
    %16 = arith.maximumf %14, %15 : vector<8x256xf32>
    %17 = arith.truncf %16 : vector<8x256xf32> to vector<8x256xbf16>
    %c0_12 = arith.constant 0 : index
    %c0_13 = arith.constant 0 : index
    %18 = vector.load %arg6[%c0_12, %c0_13] : memref<256x128xbf16, #tpu.memory_space<vmem>>, vector<256x128xbf16>
    %cst_14 = arith.constant dense<0.000000e+00> : vector<8x128xf32>
    %19 = tpu.matmul %17, %18, %cst_14 {dimension_numbers = #tpu.dot_dimension_numbers<[1], [0], [0], [1], [0, 0, 1, 1], [], []>} : vector<8x256xbf16>, vector<256x128xbf16>, vector<8x128xf32> -> vector<8x128xf32>
    %c0_15 = arith.constant 0 : index
    %c0_16 = arith.constant 0 : index
    %20 = vector.load %arg7[%c0_15, %c0_16] : memref<1x128xf32, #tpu.memory_space<vmem>>, vector<1x128xf32>
    %21 = vector.broadcast %20 : vector<1x128xf32> to vector<8x128xf32>
    %22 = arith.addf %19, %21 : vector<8x128xf32>
    %c0_17 = arith.constant 0 : index
    %c0_18 = arith.constant 0 : index
    %23 = vector.load %arg8[%c0_17, %c0_18] : memref<8x128xf32, #tpu.memory_space<vmem>>, vector<8x128xf32>
    tpu.vector_store %arg8[%c0_17, %c0_18], %22 {strides = array<i32>} : memref<8x128xf32, #tpu.memory_space<vmem>>, vector<8x128xf32>,
    return
  }
  func.func @transform_0(%arg0: i32) -> (i32, i32) {
    %c0_i32 = arith.constant 0 : i32
    %c0_i32_0 = arith.constant 0 : i32
    return %arg0, %c0_i32 : i32, i32
  }
  func.func @transform_1(%arg0: i32) -> (i32, i32) {
    %c0_i32 = arith.constant 0 : i32
    %c0_i32_0 = arith.constant 0 : i32
    %c0_i32_1 = arith.constant 0 : i32
    return %c0_i32, %c0_i32_0 : i32, i32
  }
  func.func @transform_2(%arg0: i32) -> (i32, i32) {
    %c0_i32 = arith.constant 0 : i32
    %c0_i32_0 = arith.constant 0 : i32
    %c0_i32_1 = arith.constant 0 : i32
    return %c0_i32, %c0_i32_0 : i32, i32
  }
  func.func @transform_3(%arg0: i32) -> (i32, i32) {
    %c0_i32 = arith.constant 0 : i32
    %c0_i32_0 = arith.constant 0 : i32
    %c0_i32_1 = arith.constant 0 : i32
    return %c0_i32, %c0_i32_0 : i32, i32
  }
  func.func @transform_4(%arg0: i32) -> (i32, i32) {
    %c0_i32 = arith.constant 0 : i32
    %c0_i32_0 = arith.constant 0 : i32
    %c0_i32_1 = arith.constant 0 : i32
    return %c0_i32, %c0_i32_0 : i32, i32
  }
  func.func @transform_5(%arg0: i32) -> (i32, i32) {
    %c0_i32 = arith.constant 0 : i32
    %c0_i32_0 = arith.constant 0 : i32
    %c0_i32_1 = arith.constant 0 : i32
    return %c0_i32, %c0_i32_0 : i32, i32
  }
  func.func @transform_6(%arg0: i32) -> (i32, i32) {
    %c0_i32 = arith.constant 0 : i32
    %c0_i32_0 = arith.constant 0 : i32
    %c0_i32_1 = arith.constant 0 : i32
    return %c0_i32, %c0_i32_0 : i32, i32
  }
  func.func @transform_7(%arg0: i32) -> (i32, i32) {
    %c0_i32 = arith.constant 0 : i32
    %c0_i32_0 = arith.constant 0 : i32
    return %arg0, %c0_i32 : i32, i32
  }
}

module attributes {stable_mosaic.version = 11 : i64} {
  func.func @fcnn_kernel(%arg0: i32, %arg1: memref<8x784xf32, #tpu.memory_space<vmem>>, %arg2: memref<784x512xbf16, #tpu.memory_space<vmem>>, %arg3: memref<1x512xf32, #tpu.memory_space<vmem>>, %arg4: memref<512x256xbf16, #tpu.memory_space<vmem>>, %arg5: memref<1x256xf32, #tpu.memory_space<vmem>>, %arg6: memref<256x128xbf16, #tpu.memory_space<vmem>>, %arg7: memref<1x128xf32, #tpu.memory_space<vmem>>, %arg8: memref<8x128xf32, #tpu.memory_space<vmem>>) attributes {dimension_semantics = [#tpu.dimension_semantics<parallel>], iteration_bounds = array<i64: 1>, scalar_prefetch = 0 : i64, scratch_operands = 0 : i64, tpu.core_type = #tpu.core_type<tc>, window_params = [{transform_indices = @transform_0, window_bounds = array<i64: 8, 784>}, {pipeline_mode = #tpu.pipeline_mode<synchronous>, transform_indices = @transform_1, window_bounds = array<i64: 784, 512>}, {pipeline_mode = #tpu.pipeline_mode<synchronous>, transform_indices = @transform_2, window_bounds = array<i64: 1, 512>}, {pipeline_mode = #tpu.pipeline_mode<synchronous>, transform_indices = @transform_3, window_bounds = array<i64: 512, 256>}, {pipeline_mode = #tpu.pipeline_mode<synchronous>, transform_indices = @transform_4, window_bounds = array<i64: 1, 256>}, {pipeline_mode = #tpu.pipeline_mode<synchronous>, transform_indices = @transform_5, window_bounds = array<i64: 256, 128>}, {pipeline_mode = #tpu.pipeline_mode<synchronous>, transform_indices = @transform_6, window_bounds = array<i64: 1, 128>}, {transform_indices = @transform_7, window_bounds = array<i64: 8, 128>}]} {
    %c0 = arith.constant 0 : index
    %c0_0 = arith.constant 0 : index
    %0 = vector.load %arg1[%c0, %c0_0] : memref<8x784xf32, #tpu.memory_space<vmem>>, vector<8x784xf32>
    %1 = arith.truncf %0 : vector<8x784xf32> to vector<8x784xbf16>
    %c0_1 = arith.constant 0 : index
    %c0_2 = arith.constant 0 : index
    %2 = vector.load %arg2[%c0_1, %c0_2] : memref<784x512xbf16, #tpu.memory_space<vmem>>, vector<784x512xbf16>
    %cst = arith.constant dense<0.000000e+00> : vector<8x512xf32>
    %3 = tpu.matmul %1, %2, %cst {dimension_numbers = #tpu.dot_dimension_numbers<[1], [0], [0], [1], [0, 0, 1, 1], [], []>} : vector<8x784xbf16>, vector<784x512xbf16>, vector<8x512xf32> -> vector<8x512xf32>
    %c0_3 = arith.constant 0 : index
    %c0_4 = arith.constant 0 : index
    %4 = vector.load %arg3[%c0_3, %c0_4] : memref<1x512xf32, #tpu.memory_space<vmem>>, vector<1x512xf32>
    %5 = vector.broadcast %4 : vector<1x512xf32> to vector<8x512xf32>
    %6 = arith.addf %3, %5 : vector<8x512xf32>
    %cst_5 = arith.constant 0.000000e+00 : f32
    %7 = vector.broadcast %cst_5 : f32 to vector<8x512xf32>
    %8 = arith.maximumf %6, %7 : vector<8x512xf32>
    %9 = arith.truncf %8 : vector<8x512xf32> to vector<8x512xbf16>
    %c0_6 = arith.constant 0 : index
    %c0_7 = arith.constant 0 : index
    %10 = vector.load %arg4[%c0_6, %c0_7] : memref<512x256xbf16, #tpu.memory_space<vmem>>, vector<512x256xbf16>
    %cst_8 = arith.constant dense<0.000000e+00> : vector<8x256xf32>
    %11 = tpu.matmul %9, %10, %cst_8 {dimension_numbers = #tpu.dot_dimension_numbers<[1], [0], [0], [1], [0, 0, 1, 1], [], []>} : vector<8x512xbf16>, vector<512x256xbf16>, vector<8x256xf32> -> vector<8x256xf32>
    %c0_9 = arith.constant 0 : index
    %c0_10 = arith.constant 0 : index
    %12 = vector.load %arg5[%c0_9, %c0_10] : memref<1x256xf32, #tpu.memory_space<vmem>>, vector<1x256xf32>
    %13 = vector.broadcast %12 : vector<1x256xf32> to vector<8x256xf32>
    %14 = arith.addf %11, %13 : vector<8x256xf32>
    %cst_11 = arith.constant 0.000000e+00 : f32
    %15 = vector.broadcast %cst_11 : f32 to vector<8x256xf32>
    %16 = arith.maximumf %14, %15 : vector<8x256xf32>
    %17 = arith.truncf %16 : vector<8x256xf32> to vector<8x256xbf16>
    %c0_12 = arith.constant 0 : index
    %c0_13 = arith.constant 0 : index
    %18 = vector.load %arg6[%c0_12, %c0_13] : memref<256x128xbf16, #tpu.memory_space<vmem>>, vector<256x128xbf16>
    %cst_14 = arith.constant dense<0.000000e+00> : vector<8x128xf32>
    %19 = tpu.matmul %17, %18, %cst_14 {dimension_numbers = #tpu.dot_dimension_numbers<[1], [0], [0], [1], [0, 0, 1, 1], [], []>} : vector<8x256xbf16>, vector<256x128xbf16>, vector<8x128xf32> -> vector<8x128xf32>
    %c0_15 = arith.constant 0 : index
    %c0_16 = arith.constant 0 : index
    %20 = vector.load %arg7[%c0_15, %c0_16] : memref<1x128xf32, #tpu.memory_space<vmem>>, vector<1x128xf32>
    %21 = vector.broadcast %20 : vector<1x128xf32> to vector<8x128xf32>
    %22 = arith.addf %19, %21 : vector<8x128xf32>
    %c0_17 = arith.constant 0 : index
    %c0_18 = arith.constant 0 : index
    %23 = vector.load %arg8[%c0_17, %c0_18] : memref<8x128xf32, #tpu.memory_space<vmem>>, vector<8x128xf32>
    tpu.vector_store %arg8[%c0_17, %c0_18], %22 {strides = array<i32>} : memref<8x128xf32, #tpu.memory_space<vmem>>, vector<8x128xf32>,
    return
  }
  func.func @transform_0(%arg0: i32) -> (i32, i32) {
    %c0_i32 = arith.constant 0 : i32
    %c0_i32_0 = arith.constant 0 : i32
    return %arg0, %c0_i32 : i32, i32
  }
  func.func @transform_1(%arg0: i32) -> (i32, i32) {
    %c0_i32 = arith.constant 0 : i32
    %c0_i32_0 = arith.constant 0 : i32
    %c0_i32_1 = arith.constant 0 : i32
    return %c0_i32, %c0_i32_0 : i32, i32
  }
  func.func @transform_2(%arg0: i32) -> (i32, i32) {
    %c0_i32 = arith.constant 0 : i32
    %c0_i32_0 = arith.constant 0 : i32
    %c0_i32_1 = arith.constant 0 : i32
    return %c0_i32, %c0_i32_0 : i32, i32
  }
  func.func @transform_3(%arg0: i32) -> (i32, i32) {
    %c0_i32 = arith.constant 0 : i32
    %c0_i32_0 = arith.constant 0 : i32
    %c0_i32_1 = arith.constant 0 : i32
    return %c0_i32, %c0_i32_0 : i32, i32
  }
  func.func @transform_4(%arg0: i32) -> (i32, i32) {
    %c0_i32 = arith.constant 0 : i32
    %c0_i32_0 = arith.constant 0 : i32
    %c0_i32_1 = arith.constant 0 : i32
    return %c0_i32, %c0_i32_0 : i32, i32
  }
  func.func @transform_5(%arg0: i32) -> (i32, i32) {
    %c0_i32 = arith.constant 0 : i32
    %c0_i32_0 = arith.constant 0 : i32
    %c0_i32_1 = arith.constant 0 : i32
    return %c0_i32, %c0_i32_0 : i32, i32
  }
  func.func @transform_6(%arg0: i32) -> (i32, i32) {
    %c0_i32 = arith.constant 0 : i32
    %c0_i32_0 = arith.constant 0 : i32
    %c0_i32_1 = arith.constant 0 : i32
    return %c0_i32, %c0_i32_0 : i32, i32
  }
  func.func @transform_7(%arg0: i32) -> (i32, i32) {
    %c0_i32 = arith.constant 0 : i32
    %c0_i32_0 = arith.constant 0 : i32
    return %arg0, %c0_i32 : i32, i32
  }
}

</mosaic_0001>

<bundles_post_ra>
// kernel: tpu_custom_call.1
= control target key start
LH: loop header
LB: loop body
LE: loop exit
PB: predicated region body
PF: predicated region fallthrough
CT: control target
= control target key end

     0   :  { %12 = vsyncpa [#allocation3], 0  ;;  %s3290_s0 = inlined_call_operand.hbm [shape: f32[8,784], index: 0, kind: input, shape index: {}]   ;;  %s3291_s1 = inlined_call_operand.hbm [shape: bf16[784,512], index: 1, kind: input, shape index: {}]   ;;  %s3292_s2 = inlined_call_operand.hbm [shape: f32[1,512], index: 2, kind: input, shape index: {}]   ;;  %s3293_s3 = inlined_call_operand.hbm [shape: bf16[512,256], index: 3, kind: input, shape index: {}]   ;;  %s3294_s4 = inlined_call_operand.vmem [shape: f32[1,256], index: 4, kind: input, shape index: {}]   ;;  %s3295_s5 = inlined_call_operand.hbm [shape: bf16[256,128], index: 5, kind: input, shape index: {}]   ;;  %s3296_s6 = inlined_call_operand.vmem [shape: f32[1,128], index: 6, kind: input, shape index: {}]   ;;  %s3297_s7 = inlined_call_operand.hbm [shape: f32[8,128], index: 7, kind: output, shape index: {}]  }
   0x1   :  { %13 = vsyncpa [#allocation6], 0 }
   0x2   :  { %14 = vsyncpa [#allocation9], 0 }
   0x3   :  { %15 = vsyncpa [#allocation4], 0  ;;  %s3167_s24 = smov [#allocation5]  }
   0x4   :  { %s31_s25 = sshll.u32 %s3167_s24, 4  ;;  %s32_s25 = int_to_ptr.vmem [resolvable:$true] %s31_s25 }
   0x5   :  { %s3047_s26 = scalar_lea.vmem %s32_s25, 25088  ;;  %p3052_p1 = scmp.lt.s32.totalorder %s32_s25, %s32_s25 }
   0x6   :  { %p3048_p0 = scmp.ne.s32.totalorder %s32_s25, %s3047_s26  ;;  %p3053_p2 = scmp.lt.s32.totalorder %s3047_s26, %s3047_s26 }
   0x8   :  { %p3054_p3 = por %p3053_p2, %p3052_p1 }
   0xa   :  { %p3055_p4 = pnand %p3054_p3, %p3048_p0 }
   0xc   :  { %3058 = shalt.err (!%p3055_p4)
}
   0xd   :  { %s3168_s27 = smov 256   ;;  %s3169_s28 = smov 16  }
   0xe   :  { %37 = dma.hbm_to_vmem [thread:$0]  %s3291_s1, 25088, %s32_s25, [#allocation6], %s3168_s27, %s3168_s27, %s3169_s28  }
   0xf   :  { %s3170_s8 = smov [#allocation8]  }
  0x10   :  { %s53_s9 = sshll.u32 %s3170_s8, 4  ;;  %s54_s9 = int_to_ptr.vmem [resolvable:$true] %s53_s9 }
  0x11   :  { %s3067_s10 = scalar_lea.vmem %s54_s9, 8192  ;;  %p3072_p6 = scmp.lt.s32.totalorder %s54_s9, %s54_s9 }
  0x12   :  { %p3068_p5 = scmp.ne.s32.totalorder %s54_s9, %s3067_s10  ;;  %p3073_p7 = scmp.lt.s32.totalorder %s3067_s10, %s3067_s10 }
  0x14   :  { %p3074_p8 = por %p3073_p7, %p3072_p6 }
  0x16   :  { %p3075_p9 = pnand %p3074_p8, %p3068_p5 }
  0x18   :  { %3078 = shalt.err (!%p3075_p9)
}
  0x19   :  { %s3171_s11 = smov 128   ;;  %s3172_s12 = smov 8  }
  0x1a   :  { %59 = dma.hbm_to_vmem [thread:$0]  %s3293_s3, 8192, %s54_s9, [#allocation9], %s3171_s11, %s3171_s11, %s3172_s12  }
  0x1b   :  { %s3173_s15 = smov [#allocation2]   ;;  %s3174_s17 = smov [#allocation7]  }
  0x1c   :  { %s22_s16 = sshll.u32 %s3173_s15, 4  ;;  %s44_s1 = sshll.u32 %s3174_s17, 4  ;;  %s23_s16 = int_to_ptr.vmem [resolvable:$true] %s22_s16  ;;  %s45_s1 = int_to_ptr.vmem [resolvable:$true] %s44_s1 }
  0x1d   :  { %s3087_s18 = scalar_lea.vmem %s23_s16, 896  ;;  %p3092_p11 = scmp.lt.s32.totalorder %s23_s16, %s23_s16 }
  0x1e   :  { %p3088_p10 = scmp.ne.s32.totalorder %s23_s16, %s3087_s18  ;;  %p3093_p12 = scmp.lt.s32.totalorder %s3087_s18, %s3087_s18 }
  0x20   :  { %p3094_p13 = por %p3093_p12, %p3092_p11 }
  0x22   :  { %p3095_p0 = pnand %p3094_p13, %p3088_p10 }
  0x24   :  { %3098 = shalt.err (!%p3095_p0)
}
  0x25   :  { %25 = dma.hbm_to_vmem [thread:$0]  %s3290_s0, 896, %s23_s16, [#allocation3]  }
  0x26   :  { %s3107_s21 = scalar_lea.vmem %s45_s1, 64  ;;  %p3112_p2 = scmp.lt.s32.totalorder %s45_s1, %s45_s1 }
  0x27   :  { %p3108_p1 = scmp.ne.s32.totalorder %s45_s1, %s3107_s21  ;;  %p3113_p3 = scmp.lt.s32.totalorder %s3107_s21, %s3107_s21 }
  0x29   :  { %p3114_p4 = por %p3113_p3, %p3112_p2 }
  0x2b   :  { %p3115_p5 = pnand %p3114_p4, %p3108_p1 }
  0x2d   :  { %3118 = shalt.err (!%p3115_p5)
}
  0x2e   :  { %47 = dma.hbm_to_vmem [thread:$0]  %s3292_s2, 64, %s45_s1, [#allocation6]  }
  0x2f   :  { %s3175_s23 = smov [#allocation10]  }
  0x30   :  { %s67_s24 = sshll.u32 %s3175_s23, 4  ;;  %s68_s24 = int_to_ptr.vmem [resolvable:$true] %s67_s24 }
  0x31   :  { %s3127_s25 = scalar_lea.vmem %s68_s24, 2048  ;;  %p3132_p7 = scmp.lt.s32.totalorder %s68_s24, %s68_s24 }
  0x32   :  { %p3128_p6 = scmp.ne.s32.totalorder %s68_s24, %s3127_s25  ;;  %p3133_p8 = scmp.lt.s32.totalorder %s3127_s25, %s3127_s25 }
  0x34   :  { %p3134_p9 = por %p3133_p8, %p3132_p7 }
  0x36   :  { %p3135_p10 = pnand %p3134_p9, %p3128_p6 }
  0x38   :  { %3138 = shalt.err (!%p3135_p10)
}
  0x39   :  { %s3176_s0 = smov 64   ;;  %s3177_s26 = smov 4  }
  0x3a   :  { %73 = dma.hbm_to_vmem [thread:$0]  %s3295_s5, 2048, %s68_s24, [#allocation9], %s3176_s0, %s3176_s0, %s3177_s26  }
  0x3b   :  { %3159 = dma.done.wait [#allocation3], 896  }
  0x3c   :  { %3160 = vsyncadd [#allocation3], 4294966400 }
  0x3d   :  { %3161 = dma.done.wait [#allocation6], 25152  }
  0x3e   :  { %3162 = vsyncadd [#allocation6], 4294942144 }
  0x3f   :  { %3163 = dma.done.wait [#allocation9], 10240  }
  0x40   :  { %3164 = vsyncadd [#allocation9], 4294957056  ;;  %v2633_v0 = vld [vmem:[#allocation5 + $0xe4] ss:$16 sps:$4 sm:$0xff]   ;;  %v2637_v2 = vld [vmem:[#allocation5 + $0xe0] ss:$16 sps:$4 sm:$0xff]  }
  0x41   :  { %v2635_v1 = vld [vmem:[#allocation5 + $0x2e4] ss:$16 sps:$4 sm:$0xff]   ;;  %1308 = vmatprep.subr.bf16.mxu0 %v2633_v0  ;;  %v2638_v3 = vld [vmem:[#allocation5 + $0x2e0] ss:$16 sps:$4 sm:$0xff]   ;;  %vm1304_vm0 = vcmask 130048   ;;  %s3179_s30 = smov [#allocation11]  }
  0x42   :  { %1349 = vmatprep.subr.bf16.mxu1 %v2635_v1  ;;  %v2639_v4 = vld [vmem:[#allocation5 + $0xc4] ss:$16 sps:$4 sm:$0xff]   ;;  %1309 = vmatpush1.bf16.msra.mxu0 %v2637_v2  ;;  %v2643_v6 = vld [vmem:[#allocation5 + $0xc0] ss:$16 sps:$4 sm:$0xff]   ;;  %s2308_s8 = sshll.u32 %s3179_s30, 4  ;;  %s2309_s8 = int_to_ptr.vmem [resolvable:$true] %s2308_s8 }
  0x43   :  { %1350 = vmatpush1.bf16.msra.mxu1 %v2638_v3  ;;  %v2641_v5 = vld [vmem:[#allocation5 + $0x2c4] ss:$16 sps:$4 sm:$0xff]   ;;  %1310 = vmatprep.subr.bf16.mxu0 %v2639_v4  ;;  %v2644_v7 = vld [vmem:[#allocation5 + $0x2c0] ss:$16 sps:$4 sm:$0xff]   ;;  %v92_v4 = vld [vmem:[#allocation2] sm:$0xff]  ;;  %s3139_s9 = scalar_lea.vmem %s2309_s8, 128  ;;  %p3144_p12 = scmp.lt.s32.totalorder %s2309_s8, %s2309_s8 }
  0x44   :  { %1351 = vmatprep.subr.bf16.mxu1 %v2641_v5  ;;  %v2645_v8 = vld [vmem:[#allocation5 + $0xa4] ss:$16 sps:$4 sm:$0xff]   ;;  %v2649_v10 = vld [vmem:[#allocation5 + $0xa0] ss:$16 sps:$4 sm:$0xff]   ;;  %v94_v5 = vld [vmem:[#allocation2 + $0x10] sm:$0xff]  ;;  %p3140_p11 = scmp.ne.s32.totalorder %s2309_s8, %s3139_s9  ;;  %p3145_p13 = scmp.lt.s32.totalorder %s3139_s9, %s3139_s9 }
  0x45   :  { %v2647_v9 = vld [vmem:[#allocation5 + $0x2a4] ss:$16 sps:$4 sm:$0xff]   ;;  %v2650_v11 = vld [vmem:[#allocation5 + $0x2a0] ss:$16 sps:$4 sm:$0xff]  }
  0x46   :  { %1311 = vmatpush1.bf16.msra.mxu0 %v2643_v6  ;;  %v2651_v12 = vld [vmem:[#allocation5 + $0x84] ss:$16 sps:$4 sm:$0xff]   ;;  %v2655_v14 = vld [vmem:[#allocation5 + $0x80] ss:$16 sps:$4 sm:$0xff]   ;;  %p3146_p0 = por %p3145_p13, %p3144_p12 }
  0x47   :  { %1352 = vmatpush1.bf16.msra.mxu1 %v2644_v7  ;;  %1312 = vmatprep.subr.bf16.mxu0 %v2645_v8  ;;  %v2653_v13 = vld [vmem:[#allocation5 + $0x284] ss:$16 sps:$4 sm:$0xff]   ;;  %v2656_v15 = vld [vmem:[#allocation5 + $0x280] ss:$16 sps:$4 sm:$0xff]   ;;  %v3241_v8 = vpack.c.bf16 %v92_v4, %v92_v4  ;;  %v2812_v4 = vld [vmem:[#allocation5 + $0x16c] ss:$16 sps:$4 sm:$0xff]  }
  0x48   :  { %1353 = vmatprep.subr.bf16.mxu1 %v2647_v9  ;;  %v2657_v16 = vld [vmem:[#allocation5 + $0x64] ss:$16 sps:$4 sm:$0xff]   ;;  %v2661_v18 = vld [vmem:[#allocation5 + $0x60] ss:$16 sps:$4 sm:$0xff]   ;;  %v3243_v9 = vpack.c.bf16 %v94_v5, %v94_v5  ;;  %p3147_p1 = pnand %p3146_p0, %p3140_p11 }
  0x49   :  { %v2659_v17 = vld [vmem:[#allocation5 + $0x264] ss:$16 sps:$4 sm:$0xff]   ;;  %v2662_v19 = vld [vmem:[#allocation5 + $0x260] ss:$16 sps:$4 sm:$0xff]  }
  0x4a   :  { %1313 = vmatpush1.bf16.msra.mxu0 %v2649_v10  ;;  %v2663_v20 = vld [vmem:[#allocation5 + $0x44] ss:$16 sps:$4 sm:$0xff]   ;;  %v2667_v22 = vld [vmem:[#allocation5 + $0x40] ss:$16 sps:$4 sm:$0xff]  }
  0x4b   :  { %1354 = vmatpush1.bf16.msra.mxu1 %v2650_v11  ;;  %1314 = vmatprep.subr.bf16.mxu0 %v2651_v12  ;;  %v2665_v21 = vld [vmem:[#allocation5 + $0x244] ss:$16 sps:$4 sm:$0xff]   ;;  %v2668_v23 = vld [vmem:[#allocation5 + $0x240] ss:$16 sps:$4 sm:$0xff]  }
  0x4c   :  { %1355 = vmatprep.subr.bf16.mxu1 %v2653_v13  ;;  %v2669_v24 = vld [vmem:[#allocation5 + $0x24] ss:$16 sps:$4 sm:$0xff]   ;;  %v2673_v26 = vld [vmem:[#allocation5 + $0x20] ss:$16 sps:$4 sm:$0xff]   ;;  %v2740_v13 = vld [vmem:[#allocation5 + $0xec] ss:$16 sps:$4 sm:$0xff]  }
  0x4d   :  { %v2671_v25 = vld [vmem:[#allocation5 + $0x224] ss:$16 sps:$4 sm:$0xff]   ;;  %v2674_v27 = vld [vmem:[#allocation5 + $0x220] ss:$16 sps:$4 sm:$0xff]  }
  0x4e   :  { %1315 = vmatpush1.bf16.msra.mxu0 %v2655_v14  ;;  %v2675_v28 = vld [vmem:[#allocation5 + $0x4] ss:$16 sps:$4 sm:$0xff]   ;;  %v2679_v30 = vld [vmem:[#allocation5] ss:$16 sps:$4 sm:$0xff]  }
  0x4f   :  { %1356 = vmatpush1.bf16.msra.mxu1 %v2656_v15  ;;  %1316 = vmatprep.subr.bf16.mxu0 %v2657_v16  ;;  %v2677_v29 = vld [vmem:[#allocation5 + $0x204] ss:$16 sps:$4 sm:$0xff]   ;;  %v2680_v31 = vld [vmem:[#allocation5 + $0x200] ss:$16 sps:$4 sm:$0xff]   ;;  %v98_v15 = vld [vmem:[#allocation2 + $0x30] sm:$0xff]  ;;  %v3178_v16 = vmov 0  }
  0x50   :  { %1357 = vmatprep.subr.bf16.mxu1 %v2659_v17  ;;  %v2681_v32 = vld [vmem:[#allocation5 + $0x1e4] ss:$16 sps:$4 sm:$0xff]   ;;  %v2685_v34 = vld [vmem:[#allocation5 + $0x1e0] ss:$16 sps:$4 sm:$0xff]  }
  0x51   :  { %v2683_v33 = vld [vmem:[#allocation5 + $0x3e4] ss:$16 sps:$4 sm:$0xff]   ;;  %v2686_v35 = vld [vmem:[#allocation5 + $0x3e0] ss:$16 sps:$4 sm:$0xff]  }
  0x52   :  { %1317 = vmatpush1.bf16.msra.mxu0 %v2661_v18  ;;  %v2687_v36 = vld [vmem:[#allocation5 + $0x1c4] ss:$16 sps:$4 sm:$0xff]   ;;  %v2691_v38 = vld [vmem:[#allocation5 + $0x1c0] ss:$16 sps:$4 sm:$0xff]   ;;  %v2738_v18 = vld [vmem:[#allocation5 + $0xe8] ss:$16 sps:$4 sm:$0xff]  }
  0x53   :  { %1358 = vmatpush1.bf16.msra.mxu1 %v2662_v19  ;;  %1318 = vmatprep.subr.bf16.mxu0 %v2663_v20  ;;  %v2689_v37 = vld [vmem:[#allocation5 + $0x3c4] ss:$16 sps:$4 sm:$0xff]   ;;  %v2692_v39 = vld [vmem:[#allocation5 + $0x3c0] ss:$16 sps:$4 sm:$0xff]   ;;  %v3248_v19 = vpack.c.bf16 %v98_v15, %v98_v15  ;;  %v96_v15 = vld [vmem:[#allocation2 + $0x20] sm:$0xff] }
  0x54   :  { %1359 = vmatprep.subr.bf16.mxu1 %v2665_v21  ;;  %v2693_v40 = vld [vmem:[#allocation5 + $0x1a4] ss:$16 sps:$4 sm:$0xff]   ;;  %v2697_v42 = vld [vmem:[#allocation5 + $0x1a0] ss:$16 sps:$4 sm:$0xff]   ;;  %v2746_v21 = vld [vmem:[#allocation5 + $0xcc] ss:$16 sps:$4 sm:$0xff]  }
  0x55   :  { %v2695_v41 = vld [vmem:[#allocation5 + $0x3a4] ss:$16 sps:$4 sm:$0xff]   ;;  %v2698_v43 = vld [vmem:[#allocation5 + $0x3a0] ss:$16 sps:$4 sm:$0xff]  }
  0x56   :  { %1319 = vmatpush1.bf16.msra.mxu0 %v2667_v22  ;;  %v2699_v44 = vld [vmem:[#allocation5 + $0x184] ss:$16 sps:$4 sm:$0xff]   ;;  %v2703_v47 = vld [vmem:[#allocation5 + $0x180] ss:$16 sps:$4 sm:$0xff]  }
  0x57   :  { %1360 = vmatpush1.bf16.msra.mxu1 %v2668_v23  ;;  %1320 = vmatprep.subr.bf16.mxu0 %v2669_v24  ;;  %v2701_v45 = vld [vmem:[#allocation5 + $0x384] ss:$16 sps:$4 sm:$0xff]   ;;  %v2704_v48 = vld [vmem:[#allocation5 + $0x380] ss:$16 sps:$4 sm:$0xff]   ;;  %v2744_v23 = vld [vmem:[#allocation5 + $0xc8] ss:$16 sps:$4 sm:$0xff]  }
  0x58   :  { %1361 = vmatprep.subr.bf16.mxu1 %v2671_v25  ;;  %v93_v46 = vld [vmem:[#allocation2 + $0x8] sm:$0xff]  ;;  %v95_v50 = vld [vmem:[#allocation2 + $0x18] sm:$0xff]  ;;  %v2752_v25 = vld [vmem:[#allocation5 + $0xac] ss:$16 sps:$4 sm:$0xff]  }
  0x59   :  { %v3235_v49 = vpack.c.bf16 %v93_v46, %v93_v46  ;;  %v2705_v51 = vld [vmem:[#allocation5 + $0x164] ss:$16 sps:$4 sm:$0xff]   ;;  %v3237_v52 = vpack.c.bf16 %v95_v50, %v95_v50  ;;  %v2709_v54 = vld [vmem:[#allocation5 + $0x160] ss:$16 sps:$4 sm:$0xff]  }
  0x5a   :  { %1321 = vmatpush1.bf16.msra.mxu0 %v2673_v26  ;;  %v2707_v53 = vld [vmem:[#allocation5 + $0x364] ss:$16 sps:$4 sm:$0xff]   ;;  %v2710_v55 = vld [vmem:[#allocation5 + $0x360] ss:$16 sps:$4 sm:$0xff]  }
  0x5b   :  { %1362 = vmatpush1.bf16.msra.mxu1 %v2674_v27  ;;  %1322 = vmatprep.subr.bf16.mxu0 %v2675_v28  ;;  %v2711_v56 = vld [vmem:[#allocation5 + $0x144] ss:$16 sps:$4 sm:$0xff]   ;;  %v2715_v58 = vld [vmem:[#allocation5 + $0x140] ss:$16 sps:$4 sm:$0xff]   ;;  %v2750_v27 = vld [vmem:[#allocation5 + $0xa8] ss:$16 sps:$4 sm:$0xff]  }
  0x5c   :  { %1363 = vmatprep.subr.bf16.mxu1 %v2677_v29  ;;  %1340 = vmatprep.mubr.bf16.mxu0 %v3235_v49  ;;  %v2713_v57 = vld [vmem:[#allocation5 + $0x344] ss:$16 sps:$4 sm:$0xff]   ;;  %v2716_v59 = vld [vmem:[#allocation5 + $0x340] ss:$16 sps:$4 sm:$0xff]   ;;  %v2758_v29 = vld [vmem:[#allocation5 + $0x8c] ss:$16 sps:$4 sm:$0xff]  }
  0x5d   :  { %1381 = vmatprep.mubr.bf16.mxu1 %v3237_v52  ;;  %v2717_v60 = vld [vmem:[#allocation5 + $0x124] ss:$16 sps:$4 sm:$0xff]   ;;  %v2721_v62 = vld [vmem:[#allocation5 + $0x120] ss:$16 sps:$4 sm:$0xff]  }
  0x5e   :  { %1323 = vmatpush1.bf16.msra.mxu0 %v2679_v30  ;;  %v2719_v61 = vld [vmem:[#allocation5 + $0x324] ss:$16 sps:$4 sm:$0xff]   ;;  %v2722_v63 = vld [vmem:[#allocation5 + $0x320] ss:$16 sps:$4 sm:$0xff]  }
  0x5f   :  { %1364 = vmatpush1.bf16.msra.mxu1 %v2680_v31  ;;  %1324 = vmatprep.subr.bf16.mxu0 %v2681_v32  ;;  %v2723_v0 = vld [vmem:[#allocation5 + $0x104] ss:$16 sps:$4 sm:$0xff]   ;;  %v2727_v2 = vld [vmem:[#allocation5 + $0x100] ss:$16 sps:$4 sm:$0xff]   ;;  %v2756_v31 = vld [vmem:[#allocation5 + $0x88] ss:$16 sps:$4 sm:$0xff]  }
  0x60   :  { %1365 = vmatprep.subr.bf16.mxu1 %v2683_v33  ;;  %v2725_v1 = vld [vmem:[#allocation5 + $0x304] ss:$16 sps:$4 sm:$0xff]   ;;  %v2728_v3 = vld [vmem:[#allocation5 + $0x300] ss:$16 sps:$4 sm:$0xff]   ;;  %v2764_v33 = vld [vmem:[#allocation5 + $0x6c] ss:$16 sps:$4 sm:$0xff]  }
  0x61   :  { %v2731_v6 = vld [vmem:[#allocation5 + $0x4e4] ss:$16 sps:$4 sm:$0xff]   ;;  %v2729_v10 = vld [vmem:[#allocation5 + $0x4e0] ss:$16 sps:$4 sm:$0xff]  }
  0x62   :  { %1325 = vmatpush2.bf16.msra.mxu0 %v2685_v34  ;;  %v2734_v7 = vld [vmem:[#allocation5 + $0x604] ss:$16 sps:$4 sm:$0xff]   ;;  %v2732_v11 = vld [vmem:[#allocation5 + $0x600] ss:$16 sps:$4 sm:$0xff]  }
  0x63   :  { %1366 = vmatpush2.bf16.msra.mxu1 %v2686_v35  ;;  %1326 = vmatprep.subr.bf16.mxu0 %v2687_v36  ;;  %v2737_v12 = vld [vmem:[#allocation5 + $0x4c4] ss:$16 sps:$4 sm:$0xff]   ;;  %v2735_v14 = vld [vmem:[#allocation5 + $0x4c0] ss:$16 sps:$4 sm:$0xff]  }
  0x64   :  { %1367 = vmatprep.subr.bf16.mxu1 %v2689_v37  ;;  %v2743_v17 = vld [vmem:[#allocation5 + $0x4a4] ss:$16 sps:$4 sm:$0xff]   ;;  %v2741_v20 = vld [vmem:[#allocation5 + $0x4a0] ss:$16 sps:$4 sm:$0xff]   ;;  %v2762_v37 = vld [vmem:[#allocation5 + $0x68] ss:$16 sps:$4 sm:$0xff]  }
  0x65   :  { %v2749_v22 = vld [vmem:[#allocation5 + $0x484] ss:$16 sps:$4 sm:$0xff]   ;;  %v2747_v24 = vld [vmem:[#allocation5 + $0x480] ss:$16 sps:$4 sm:$0xff]  }
  0x66   :  { %1327 = vmatpush2.bf16.msra.mxu0 %v2691_v38  ;;  %v2755_v26 = vld [vmem:[#allocation5 + $0x464] ss:$16 sps:$4 sm:$0xff]   ;;  %v2753_v28 = vld [vmem:[#allocation5 + $0x460] ss:$16 sps:$4 sm:$0xff]  }
  0x67   :  { %1368 = vmatpush2.bf16.msra.mxu1 %v2692_v39  ;;  %1328 = vmatprep.subr.bf16.mxu0 %v2693_v40  ;;  %v2761_v30 = vld [vmem:[#allocation5 + $0x444] ss:$16 sps:$4 sm:$0xff]   ;;  %v2759_v32 = vld [vmem:[#allocation5 + $0x440] ss:$16 sps:$4 sm:$0xff]   ;;  %v2770_v39 = vld [vmem:[#allocation5 + $0x4c] ss:$16 sps:$4 sm:$0xff]  }
  0x68   :  { %1369 = vmatprep.subr.bf16.mxu1 %v2695_v41  ;;  %v2767_v34 = vld [vmem:[#allocation5 + $0x424] ss:$16 sps:$4 sm:$0xff]   ;;  %v2765_v38 = vld [vmem:[#allocation5 + $0x420] ss:$16 sps:$4 sm:$0xff]   ;;  %v2768_v41 = vld [vmem:[#allocation5 + $0x48] ss:$16 sps:$4 sm:$0xff]  }
  0x69   :  { %v97_v35 = vld [vmem:[#allocation2 + $0x28] sm:$0xff] }
  0x6a   :  { %1329 = vmatpush2.bf16.msra.mxu0 %v2697_v42  ;;  %v3253_v36 = vpack.c.bf16 %v97_v35, %v97_v35  ;;  %v2773_v40 = vld [vmem:[#allocation5 + $0x404] ss:$16 sps:$4 sm:$0xff]   ;;  %v2771_v42 = vld [vmem:[#allocation5 + $0x400] ss:$16 sps:$4 sm:$0xff]   ;;  %v2851_v35 = vld [vmem:[#allocation5 + $0x26c] ss:$16 sps:$4 sm:$0xff]  }
  0x6b   :  { %1370 = vmatpush2.bf16.msra.mxu1 %v2698_v43  ;;  %1330 = vmatprep.subr.bf16.mxu0 %v2699_v44  ;;  %v2776_v43 = vld [vmem:[#allocation5 + $0x2c] ss:$16 sps:$4 sm:$0xff]   ;;  %v2779_v44 = vld [vmem:[#allocation5 + $0x5e4] ss:$16 sps:$4 sm:$0xff]   ;;  %v2777_v46 = vld [vmem:[#allocation5 + $0x5e0] ss:$16 sps:$4 sm:$0xff]  }
  0x6c   :  { %1371 = vmatprep.subr.bf16.mxu1 %v2701_v45  ;;  %v2774_v45 = vld [vmem:[#allocation5 + $0x28] ss:$16 sps:$4 sm:$0xff]   ;;  %v2783_v50 = vld [vmem:[#allocation5 + $0x5c0] ss:$16 sps:$4 sm:$0xff]   ;;  %v2815_v5 = vld [vmem:[#allocation5 + $0x524] ss:$16 sps:$4 sm:$0xff]  }
  0x6e   :  { %1331 = vmatpush2.bf16.msra.mxu0 %v2703_v47  ;;  %v2782_v47 = vld [vmem:[#allocation5 + $0xc] ss:$16 sps:$4 sm:$0xff]  }
  0x6f   :  { %1372 = vmatpush2.bf16.msra.mxu1 %v2704_v48  ;;  %1332 = vmatprep.subr.bf16.mxu0 %v2705_v51  ;;  %v2785_v48 = vld [vmem:[#allocation5 + $0x5c4] ss:$16 sps:$4 sm:$0xff]   ;;  %v2788_v51 = vld [vmem:[#allocation5 + $0x1ec] ss:$16 sps:$4 sm:$0xff]  }
  0x70   :  { %1373 = vmatprep.subr.bf16.mxu1 %v2707_v53  ;;  %v2791_v53 = vld [vmem:[#allocation5 + $0x5a4] ss:$16 sps:$4 sm:$0xff]  }
  0x72   :  { %1333 = vmatpush2.bf16.msra.mxu0 %v2709_v54  ;;  %v2786_v54 = vld [vmem:[#allocation5 + $0x1e8] ss:$16 sps:$4 sm:$0xff]  }
  0x73   :  { %1374 = vmatpush2.bf16.msra.mxu1 %v2710_v55  ;;  %1334 = vmatprep.subr.bf16.mxu0 %v2711_v56  ;;  %v2789_v55 = vld [vmem:[#allocation5 + $0x5a0] ss:$16 sps:$4 sm:$0xff]   ;;  %v2794_v56 = vld [vmem:[#allocation5 + $0x1cc] ss:$16 sps:$4 sm:$0xff]  }
  0x74   :  { %1375 = vmatprep.subr.bf16.mxu1 %v2713_v57  ;;  %v2797_v57 = vld [vmem:[#allocation5 + $0x584] ss:$16 sps:$4 sm:$0xff]  }
  0x76   :  { %1335 = vmatpush2.bf16.msra.mxu0 %v2715_v58  ;;  %v2792_v58 = vld [vmem:[#allocation5 + $0x1c8] ss:$16 sps:$4 sm:$0xff]  }
  0x77   :  { %1376 = vmatpush2.bf16.msra.mxu1 %v2716_v59  ;;  %1336 = vmatprep.subr.bf16.mxu0 %v2717_v60  ;;  %v2795_v59 = vld [vmem:[#allocation5 + $0x580] ss:$16 sps:$4 sm:$0xff]   ;;  %v2800_v60 = vld [vmem:[#allocation5 + $0x1ac] ss:$16 sps:$4 sm:$0xff]  }
  0x78   :  { %1377 = vmatprep.subr.bf16.mxu1 %v2719_v61  ;;  %v2803_v61 = vld [vmem:[#allocation5 + $0x564] ss:$16 sps:$4 sm:$0xff]  }
  0x7a   :  { %1337 = vmatpush2.bf16.msra.mxu0 %v2721_v62  ;;  %v2798_v62 = vld [vmem:[#allocation5 + $0x1a8] ss:$16 sps:$4 sm:$0xff]  }
  0x7b   :  { %1378 = vmatpush2.bf16.msra.mxu1 %v2722_v63  ;;  %1338 = vmatprep.subr.bf16.mxu0 %v2723_v0  ;;  %v2801_v63 = vld [vmem:[#allocation5 + $0x560] ss:$16 sps:$4 sm:$0xff]   ;;  %v2806_v0 = vld [vmem:[#allocation5 + $0x18c] ss:$16 sps:$4 sm:$0xff]  }
  0x7c   :  { %1379 = vmatprep.subr.bf16.mxu1 %v2725_v1  ;;  %v2809_v1 = vld [vmem:[#allocation5 + $0x544] ss:$16 sps:$4 sm:$0xff]  }
  0x7e   :  { %1339 = vmatpush2.bf16.msra.mxu0 %v2727_v2  ;;  %v2804_v2 = vld [vmem:[#allocation5 + $0x188] ss:$16 sps:$4 sm:$0xff]  }
  0x7f   :  { %1380 = vmatpush2.bf16.msra.mxu1 %v2728_v3  ;;  %1390 = vmatprep.subr.bf16.mxu0 %v2731_v6  ;;  %v2807_v3 = vld [vmem:[#allocation5 + $0x540] ss:$16 sps:$4 sm:$0xff]   ;;  %v2810_v6 = vld [vmem:[#allocation5 + $0x168] ss:$16 sps:$4 sm:$0xff]  }
  0x80   :  { %1445 = vmatprep.subr.bf16.mxu1 %v2734_v7  ;;  %v2813_v7 = vld [vmem:[#allocation5 + $0x520] ss:$16 sps:$4 sm:$0xff]  }
  0x81   :  { %1341 = vmatmul.mubr.bf16.vlgmr.msra.gmra.mxu0 %v3241_v8 }
  0x82   :  { %1382 = vmatmul.mubr.bf16.vlgmr.msra.gmra.mxu1 %v3243_v9  ;;  %1391 = vmatpush1.bf16.msra.mxu0 %v2729_v10  ;;  %v2818_v10 = vld [vmem:[#allocation5 + $0x14c] ss:$16 sps:$4 sm:$0xff]  }
  0x83   :  { %1446 = vmatpush1.bf16.msra.mxu1 %v2732_v11  ;;  %1392 = vmatprep.subr.bf16.mxu0 %v2737_v12  ;;  %v2821_v11 = vld [vmem:[#allocation5 + $0x504] ss:$16 sps:$4 sm:$0xff]   ;;  %v2816_v12 = vld [vmem:[#allocation5 + $0x148] ss:$16 sps:$4 sm:$0xff]  }
  0x84   :  { %1463 = vmatprep.mubr.bf16.mxu1 %v3178_v16  ;;  %1472 = vmatprep.subr.bf16.mxu1 %v2740_v13  ;;  %v2819_v13 = vld [vmem:[#allocation5 + $0x500] ss:$16 sps:$4 sm:$0xff]  }
  0x85   :  { %1422 = vmatprep.mubr.bf16.mxu0 %v3253_v36 }
  0x86   :  { %1393 = vmatpush1.bf16.msra.mxu0 %v2735_v14  ;;  %v2824_v14 = vld [vmem:[#allocation5 + $0x12c] ss:$16 sps:$4 sm:$0xff]  }
  0x87   :  { %1394 = vmatprep.subr.bf16.mxu0 %v2743_v17  ;;  %v2827_v17 = vld [vmem:[#allocation5 + $0x2ec] ss:$16 sps:$4 sm:$0xff]  }
  0x8a   :  { %2515 = vmatmul.mubr.msk.bf16.vlgmr.msra.gmra.mxu1 %vm1304_vm0, %v3248_v19  ;;  %1395 = vmatpush1.bf16.msra.mxu0 %v2741_v20  ;;  %v3256_v20 = vpack.c.bf16 %v96_v15, %v96_v15  ;;  %v2914_v15 = vld [vmem:[#allocation5 + $0x54c] ss:$16 sps:$4 sm:$0xff]  }
  0x8b   :  { %1473 = vmatpush1.bf16.msra.mxu1 %v2738_v18  ;;  %1396 = vmatprep.subr.bf16.mxu0 %v2749_v22  ;;  %v2822_v18 = vld [vmem:[#allocation5 + $0x128] ss:$16 sps:$4 sm:$0xff]   ;;  %v2830_v22 = vld [vmem:[#allocation5 + $0x10c] ss:$16 sps:$4 sm:$0xff]  }
  0x8c   :  { %1474 = vmatprep.subr.bf16.mxu1 %v2746_v21  ;;  %1504 = vmatprep.mubr.bf16.mxu1 %v3235_v49  ;;  %v2780_v49 = vld [vmem:[#allocation5 + $0x8] ss:$16 sps:$4 sm:$0xff]  }
  0x8d   :  { %v2825_v21 = vld [vmem:[#allocation5 + $0x2e8] ss:$16 sps:$4 sm:$0xff]  }
  0x8e   :  { %1397 = vmatpush1.bf16.msra.mxu0 %v2747_v24  ;;  %v2828_v24 = vld [vmem:[#allocation5 + $0x108] ss:$16 sps:$4 sm:$0xff]  }
  0x8f   :  { %1475 = vmatpush1.bf16.msra.mxu1 %v2744_v23  ;;  %1398 = vmatprep.subr.bf16.mxu0 %v2755_v26  ;;  %v2833_v23 = vld [vmem:[#allocation5 + $0x2cc] ss:$16 sps:$4 sm:$0xff]  }
  0x90   :  { %1476 = vmatprep.subr.bf16.mxu1 %v2752_v25  ;;  %v2831_v25 = vld [vmem:[#allocation5 + $0x2c8] ss:$16 sps:$4 sm:$0xff]   ;;  %v2836_v26 = vld [vmem:[#allocation5 + $0x4ec] ss:$16 sps:$4 sm:$0xff]  }
  0x92   :  { %1399 = vmatpush1.bf16.msra.mxu0 %v2753_v28  ;;  %v2834_v28 = vld [vmem:[#allocation5 + $0x4e8] ss:$16 sps:$4 sm:$0xff]  }
  0x93   :  { %1477 = vmatpush1.bf16.msra.mxu1 %v2750_v27  ;;  %1400 = vmatprep.subr.bf16.mxu0 %v2761_v30  ;;  %v2839_v27 = vld [vmem:[#allocation5 + $0x2ac] ss:$16 sps:$4 sm:$0xff]  }
  0x94   :  { %1478 = vmatprep.subr.bf16.mxu1 %v2758_v29  ;;  %v2837_v29 = vld [vmem:[#allocation5 + $0x2a8] ss:$16 sps:$4 sm:$0xff]   ;;  %v2842_v30 = vld [vmem:[#allocation5 + $0x4cc] ss:$16 sps:$4 sm:$0xff]  }
  0x96   :  { %1401 = vmatpush1.bf16.msra.mxu0 %v2759_v32  ;;  %v2840_v32 = vld [vmem:[#allocation5 + $0x4c8] ss:$16 sps:$4 sm:$0xff]  }
  0x97   :  { %1479 = vmatpush1.bf16.msra.mxu1 %v2756_v31  ;;  %1402 = vmatprep.subr.bf16.mxu0 %v2767_v34  ;;  %v2845_v31 = vld [vmem:[#allocation5 + $0x28c] ss:$16 sps:$4 sm:$0xff]  }
  0x98   :  { %1480 = vmatprep.subr.bf16.mxu1 %v2764_v33  ;;  %v2843_v33 = vld [vmem:[#allocation5 + $0x288] ss:$16 sps:$4 sm:$0xff]   ;;  %v2848_v34 = vld [vmem:[#allocation5 + $0x4ac] ss:$16 sps:$4 sm:$0xff]  }
  0x9a   :  { %1403 = vmatpush1.bf16.msra.mxu0 %v2765_v38  ;;  %v2854_v38 = vld [vmem:[#allocation5 + $0x48c] ss:$16 sps:$4 sm:$0xff]  }
  0x9b   :  { %1481 = vmatpush1.bf16.msra.mxu1 %v2762_v37  ;;  %1404 = vmatprep.subr.bf16.mxu0 %v2773_v40  ;;  %v2846_v37 = vld [vmem:[#allocation5 + $0x4a8] ss:$16 sps:$4 sm:$0xff]  }
  0x9c   :  { %1482 = vmatprep.subr.bf16.mxu1 %v2770_v39  ;;  %v2857_v39 = vld [vmem:[#allocation5 + $0x24c] ss:$16 sps:$4 sm:$0xff]   ;;  %v2852_v40 = vld [vmem:[#allocation5 + $0x488] ss:$16 sps:$4 sm:$0xff]  }
  0x9e   :  { %1405 = vmatpush1.bf16.msra.mxu0 %v2771_v42  ;;  %v2863_v42 = vld [vmem:[#allocation5 + $0x22c] ss:$16 sps:$4 sm:$0xff]  }
  0x9f   :  { %1483 = vmatpush1.bf16.msra.mxu1 %v2768_v41  ;;  %1406 = vmatprep.subr.bf16.mxu0 %v2779_v44  ;;  %v2860_v41 = vld [vmem:[#allocation5 + $0x46c] ss:$16 sps:$4 sm:$0xff]   ;;  %v2861_v44 = vld [vmem:[#allocation5 + $0x228] ss:$16 sps:$4 sm:$0xff]  }
  0xa0   :  { %1484 = vmatprep.subr.bf16.mxu1 %v2776_v43  ;;  %v2858_v43 = vld [vmem:[#allocation5 + $0x468] ss:$16 sps:$4 sm:$0xff]  }
  0xa2   :  { %1407 = vmatpush2.bf16.msra.mxu0 %v2777_v46  ;;  %v2864_v46 = vld [vmem:[#allocation5 + $0x448] ss:$16 sps:$4 sm:$0xff]  }
  0xa3   :  { %1485 = vmatpush1.bf16.msra.mxu1 %v2774_v45  ;;  %1408 = vmatprep.subr.bf16.mxu0 %v2785_v48  ;;  %v2869_v45 = vld [vmem:[#allocation5 + $0x20c] ss:$16 sps:$4 sm:$0xff]  }
  0xa4   :  { %1486 = vmatprep.subr.bf16.mxu1 %v2782_v47  ;;  %v2867_v47 = vld [vmem:[#allocation5 + $0x208] ss:$16 sps:$4 sm:$0xff]   ;;  %v2872_v48 = vld [vmem:[#allocation5 + $0x42c] ss:$16 sps:$4 sm:$0xff]  }
  0xa6   :  { %1409 = vmatpush2.bf16.msra.mxu0 %v2783_v50  ;;  %v2870_v50 = vld [vmem:[#allocation5 + $0x428] ss:$16 sps:$4 sm:$0xff]  }
  0xa7   :  { %1487 = vmatpush1.bf16.msra.mxu1 %v2780_v49  ;;  %1410 = vmatprep.subr.bf16.mxu0 %v2791_v53  ;;  %v2875_v49 = vld [vmem:[#allocation5 + $0x3ec] ss:$16 sps:$4 sm:$0xff]  }
  0xa8   :  { %1488 = vmatprep.subr.bf16.mxu1 %v2788_v51  ;;  %v2873_v51 = vld [vmem:[#allocation5 + $0x3e8] ss:$16 sps:$4 sm:$0xff]   ;;  %v2878_v53 = vld [vmem:[#allocation5 + $0x40c] ss:$16 sps:$4 sm:$0xff]  }
  0xaa   :  { %1411 = vmatpush2.bf16.msra.mxu0 %v2789_v55  ;;  %v2876_v55 = vld [vmem:[#allocation5 + $0x408] ss:$16 sps:$4 sm:$0xff]  }
  0xab   :  { %1489 = vmatpush2.bf16.msra.mxu1 %v2786_v54  ;;  %1412 = vmatprep.subr.bf16.mxu0 %v2797_v57  ;;  %v2881_v54 = vld [vmem:[#allocation5 + $0x3cc] ss:$16 sps:$4 sm:$0xff]  }
  0xac   :  { %1490 = vmatprep.subr.bf16.mxu1 %v2794_v56  ;;  %v2879_v56 = vld [vmem:[#allocation5 + $0x3c8] ss:$16 sps:$4 sm:$0xff]   ;;  %v2884_v57 = vld [vmem:[#allocation5 + $0x5ec] ss:$16 sps:$4 sm:$0xff]  }
  0xae   :  { %1413 = vmatpush2.bf16.msra.mxu0 %v2795_v59  ;;  %v2882_v59 = vld [vmem:[#allocation5 + $0x5e8] ss:$16 sps:$4 sm:$0xff]  }
  0xaf   :  { %1491 = vmatpush2.bf16.msra.mxu1 %v2792_v58  ;;  %1414 = vmatprep.subr.bf16.mxu0 %v2803_v61  ;;  %v2887_v58 = vld [vmem:[#allocation5 + $0x3ac] ss:$16 sps:$4 sm:$0xff]  }
  0xb0   :  { %1492 = vmatprep.subr.bf16.mxu1 %v2800_v60  ;;  %v2885_v60 = vld [vmem:[#allocation5 + $0x3a8] ss:$16 sps:$4 sm:$0xff]   ;;  %v2890_v61 = vld [vmem:[#allocation5 + $0x5cc] ss:$16 sps:$4 sm:$0xff]  }
  0xb2   :  { %1415 = vmatpush2.bf16.msra.mxu0 %v2801_v63  ;;  %v2888_v63 = vld [vmem:[#allocation5 + $0x5c8] ss:$16 sps:$4 sm:$0xff]  }
  0xb3   :  { %1493 = vmatpush2.bf16.msra.mxu1 %v2798_v62  ;;  %1416 = vmatprep.subr.bf16.mxu0 %v2809_v1  ;;  %v2893_v62 = vld [vmem:[#allocation5 + $0x38c] ss:$16 sps:$4 sm:$0xff]  }
  0xb4   :  { %1494 = vmatprep.subr.bf16.mxu1 %v2806_v0  ;;  %v2891_v0 = vld [vmem:[#allocation5 + $0x388] ss:$16 sps:$4 sm:$0xff]   ;;  %v2896_v1 = vld [vmem:[#allocation5 + $0x5ac] ss:$16 sps:$4 sm:$0xff]  }
  0xb6   :  { %1417 = vmatpush2.bf16.msra.mxu0 %v2807_v3  ;;  %v2894_v3 = vld [vmem:[#allocation5 + $0x5a8] ss:$16 sps:$4 sm:$0xff]  }
  0xb7   :  { %1495 = vmatpush2.bf16.msra.mxu1 %v2804_v2  ;;  %1418 = vmatprep.subr.bf16.mxu0 %v2815_v5  ;;  %v2899_v2 = vld [vmem:[#allocation5 + $0x36c] ss:$16 sps:$4 sm:$0xff]  }
  0xb8   :  { %1496 = vmatprep.subr.bf16.mxu1 %v2812_v4  ;;  %v2897_v4 = vld [vmem:[#allocation5 + $0x368] ss:$16 sps:$4 sm:$0xff]   ;;  %v2902_v5 = vld [vmem:[#allocation5 + $0x58c] ss:$16 sps:$4 sm:$0xff]  }
  0xba   :  { %1419 = vmatpush2.bf16.msra.mxu0 %v2813_v7  ;;  %v2900_v7 = vld [vmem:[#allocation5 + $0x588] ss:$16 sps:$4 sm:$0xff]  }
  0xbb   :  { %1497 = vmatpush2.bf16.msra.mxu1 %v2810_v6  ;;  %1420 = vmatprep.subr.bf16.mxu0 %v2821_v11  ;;  %v2905_v6 = vld [vmem:[#allocation5 + $0x34c] ss:$16 sps:$4 sm:$0xff]  }
  0xbc   :  { %1498 = vmatprep.subr.bf16.mxu1 %v2818_v10  ;;  %v2903_v10 = vld [vmem:[#allocation5 + $0x348] ss:$16 sps:$4 sm:$0xff]   ;;  %v2908_v11 = vld [vmem:[#allocation5 + $0x56c] ss:$16 sps:$4 sm:$0xff]  }
  0xbe   :  { %1421 = vmatpush2.bf16.msra.mxu0 %v2819_v13  ;;  %v2906_v13 = vld [vmem:[#allocation5 + $0x568] ss:$16 sps:$4 sm:$0xff]  }
  0xbf   :  { %1499 = vmatpush2.bf16.msra.mxu1 %v2816_v12  ;;  %1513 = vmatprep.subr.bf16.mxu0 %v2827_v17  ;;  %v2911_v12 = vld [vmem:[#allocation5 + $0x32c] ss:$16 sps:$4 sm:$0xff]  }
  0xc0   :  { %1500 = vmatprep.subr.bf16.mxu1 %v2824_v14  ;;  %v2909_v14 = vld [vmem:[#allocation5 + $0x328] ss:$16 sps:$4 sm:$0xff]   ;;  %v2917_v17 = vld [vmem:[#allocation5 + $0x30c] ss:$16 sps:$4 sm:$0xff]  }
  0xc1   :  { %1423 = vmatmul.mubr.bf16.vlgmr.msra.gmra.mxu0 %v3256_v20 }
  0xc2   :  { %1514 = vmatpush1.bf16.msra.mxu0 %v2825_v21  ;;  %1545 = vmatprep.mubr.bf16.mxu0 %v3237_v52  ;;  %v2849_v52 = vld [vmem:[#allocation5 + $0x268] ss:$16 sps:$4 sm:$0xff]  }
  0xc3   :  { %1501 = vmatpush2.bf16.msra.mxu1 %v2822_v18  ;;  %1515 = vmatprep.subr.bf16.mxu0 %v2833_v23  ;;  %v2912_v18 = vld [vmem:[#allocation5 + $0x548] ss:$16 sps:$4 sm:$0xff]  }
  0xc4   :  { %1502 = vmatprep.subr.bf16.mxu1 %v2830_v22  ;;  %v2915_v21 = vld [vmem:[#allocation5 + $0x308] ss:$16 sps:$4 sm:$0xff]   ;;  %v2920_v22 = vld [vmem:[#allocation5 + $0x52c] ss:$16 sps:$4 sm:$0xff]  }
  0xc5   :  { %v2929_v23 = vld [vmem:[#allocation8 + $0x74] ss:$8 sps:$4 sm:$0xff]  }
  0xc6   :  { %1516 = vmatpush1.bf16.msra.mxu0 %v2831_v25  ;;  %v2927_v25 = vld [vmem:[#allocation8 + $0x70] ss:$8 sps:$4 sm:$0xff]  }
  0xc7   :  { %1503 = vmatpush2.bf16.msra.mxu1 %v2828_v24  ;;  %1517 = vmatprep.subr.bf16.mxu0 %v2839_v27  ;;  %v2918_v24 = vld [vmem:[#allocation5 + $0x528] ss:$16 sps:$4 sm:$0xff]  }
  0xc8   :  { %1554 = vmatprep.subr.bf16.mxu1 %v2836_v26  ;;  %v2923_v26 = vld [vmem:[#allocation5 + $0x50c] ss:$16 sps:$4 sm:$0xff]   ;;  %v2932_v27 = vld [vmem:[#allocation8 + $0x64] ss:$8 sps:$4 sm:$0xff]  }
  0xca   :  { %1505 = vmatmul.mubr.bf16.vlgmr.msra.gmra.mxu1 %v3241_v8  ;;  %1518 = vmatpush1.bf16.msra.mxu0 %v2837_v29  ;;  %v2855_v8 = vld [vmem:[#allocation5 + $0x248] ss:$16 sps:$4 sm:$0xff]   ;;  %v2930_v29 = vld [vmem:[#allocation8 + $0x60] ss:$8 sps:$4 sm:$0xff]  }
  0xcb   :  { %1555 = vmatpush1.bf16.msra.mxu1 %v2834_v28  ;;  %1519 = vmatprep.subr.bf16.mxu0 %v2845_v31  ;;  %v2921_v28 = vld [vmem:[#allocation5 + $0x508] ss:$16 sps:$4 sm:$0xff]  }
  0xcc   :  { %1556 = vmatprep.subr.bf16.mxu1 %v2842_v30  ;;  %1586 = vmatprep.mubr.bf16.mxu1 %v3253_v36  ;;  %v2866_v36 = vld [vmem:[#allocation5 + $0x44c] ss:$16 sps:$4 sm:$0xff]   ;;  %v2935_v31 = vld [vmem:[#allocation8 + $0x54] ss:$8 sps:$4 sm:$0xff]  }
  0xcd   :  { %v2926_v30 = vld [vmem:[#allocation5 + $0x60c] ss:$16 sps:$4 sm:$0xff]  }
  0xce   :  { %1520 = vmatpush1.bf16.msra.mxu0 %v2843_v33  ;;  %v2933_v33 = vld [vmem:[#allocation8 + $0x50] ss:$8 sps:$4 sm:$0xff]  }
  0xcf   :  { %1557 = vmatpush1.bf16.msra.mxu1 %v2840_v32  ;;  %1521 = vmatprep.subr.bf16.mxu0 %v2851_v35  ;;  %v2924_v32 = vld [vmem:[#allocation5 + $0x608] ss:$16 sps:$4 sm:$0xff]  }
  0xd0   :  { %1558 = vmatprep.subr.bf16.mxu1 %v2848_v34  ;;  %v2938_v34 = vld [vmem:[#allocation8 + $0x44] ss:$8 sps:$4 sm:$0xff]   ;;  %v2941_v35 = vld [vmem:[#allocation8 + $0x34] ss:$8 sps:$4 sm:$0xff]  }
  0xd2   :  { %1522 = vmatpush1.bf16.msra.mxu0 %v2849_v52  ;;  %v2975_v52 = vld [vmem:[#allocation8 + $0x170] ss:$8 sps:$4 sm:$0xff]  }
  0xd3   :  { %1559 = vmatpush1.bf16.msra.mxu1 %v2846_v37  ;;  %1523 = vmatprep.subr.bf16.mxu0 %v2857_v39  ;;  %v2939_v37 = vld [vmem:[#allocation8 + $0x30] ss:$8 sps:$4 sm:$0xff]   ;;  %v2944_v39 = vld [vmem:[#allocation8 + $0x24] ss:$8 sps:$4 sm:$0xff]  }
  0xd4   :  { %1560 = vmatprep.subr.bf16.mxu1 %v2854_v38  ;;  %v2977_v38 = vld [vmem:[#allocation8 + $0x174] ss:$8 sps:$4 sm:$0xff]  }
  0xd6   :  { %1524 = vmatpush1.bf16.msra.mxu0 %v2855_v8  ;;  %v2942_v8 = vld [vmem:[#allocation8 + $0x20] ss:$8 sps:$4 sm:$0xff]  }
  0xd7   :  { %1561 = vmatpush1.bf16.msra.mxu1 %v2852_v40  ;;  %1525 = vmatprep.subr.bf16.mxu0 %v2863_v42  ;;  %v2980_v40 = vld [vmem:[#allocation8 + $0x164] ss:$8 sps:$4 sm:$0xff]   ;;  %v2981_v42 = vld [vmem:[#allocation8 + $0x150] ss:$8 sps:$4 sm:$0xff]  }
  0xd8   :  { %1562 = vmatprep.subr.bf16.mxu1 %v2860_v41  ;;  %v2947_v41 = vld [vmem:[#allocation8 + $0x14] ss:$8 sps:$4 sm:$0xff]  }
  0xda   :  { %1526 = vmatpush1.bf16.msra.mxu0 %v2861_v44  ;;  %v2986_v44 = vld [vmem:[#allocation8 + $0x144] ss:$8 sps:$4 sm:$0xff]  }
  0xdb   :  { %1563 = vmatpush1.bf16.msra.mxu1 %v2858_v43  ;;  %1527 = vmatprep.subr.bf16.mxu0 %v2869_v45  ;;  %v2945_v43 = vld [vmem:[#allocation8 + $0x10] ss:$8 sps:$4 sm:$0xff]   ;;  %v2984_v45 = vld [vmem:[#allocation8 + $0x140] ss:$8 sps:$4 sm:$0xff]  }
  0xdc   :  { %1564 = vmatprep.subr.bf16.mxu1 %v2866_v36  ;;  %v2950_v36 = vld [vmem:[#allocation8 + $0x4] ss:$8 sps:$4 sm:$0xff]  }
  0xde   :  { %1528 = vmatpush1.bf16.msra.mxu0 %v2867_v47  ;;  %v2953_v47 = vld [vmem:[#allocation8 + $0xf4] ss:$8 sps:$4 sm:$0xff]  }
  0xdf   :  { %1565 = vmatpush1.bf16.msra.mxu1 %v2864_v46  ;;  %1529 = vmatprep.subr.bf16.mxu0 %v2875_v49  ;;  %v2989_v46 = vld [vmem:[#allocation8 + $0x134] ss:$8 sps:$4 sm:$0xff]   ;;  %v2951_v49 = vld [vmem:[#allocation8 + $0xf0] ss:$8 sps:$4 sm:$0xff]  }
  0xe0   :  { %1566 = vmatprep.subr.bf16.mxu1 %v2872_v48  ;;  %v2987_v48 = vld [vmem:[#allocation8 + $0x130] ss:$8 sps:$4 sm:$0xff]  }
  0xe2   :  { %1530 = vmatpush2.bf16.msra.mxu0 %v2873_v51  ;;  %v2956_v51 = vld [vmem:[#allocation8 + $0xe4] ss:$8 sps:$4 sm:$0xff]  }
  0xe3   :  { %1567 = vmatpush1.bf16.msra.mxu1 %v2870_v50  ;;  %1531 = vmatprep.subr.bf16.mxu0 %v2881_v54  ;;  %v2992_v50 = vld [vmem:[#allocation8 + $0x124] ss:$8 sps:$4 sm:$0xff]   ;;  %v2954_v54 = vld [vmem:[#allocation8 + $0xe0] ss:$8 sps:$4 sm:$0xff]  }
  0xe4   :  { %1568 = vmatprep.subr.bf16.mxu1 %v2878_v53  ;;  %v2990_v53 = vld [vmem:[#allocation8 + $0x120] ss:$8 sps:$4 sm:$0xff]  }
  0xe6   :  { %1532 = vmatpush2.bf16.msra.mxu0 %v2879_v56  ;;  %v2959_v56 = vld [vmem:[#allocation8 + $0xd4] ss:$8 sps:$4 sm:$0xff]  }
  0xe7   :  { %1569 = vmatpush1.bf16.msra.mxu1 %v2876_v55  ;;  %1533 = vmatprep.subr.bf16.mxu0 %v2887_v58  ;;  %v2995_v55 = vld [vmem:[#allocation8 + $0x114] ss:$8 sps:$4 sm:$0xff]   ;;  %v2957_v58 = vld [vmem:[#allocation8 + $0xd0] ss:$8 sps:$4 sm:$0xff]  }
  0xe8   :  { %1570 = vmatprep.subr.bf16.mxu1 %v2884_v57  ;;  %v2993_v57 = vld [vmem:[#allocation8 + $0x110] ss:$8 sps:$4 sm:$0xff]  }
  0xea   :  { %1534 = vmatpush2.bf16.msra.mxu0 %v2885_v60  ;;  %v2962_v60 = vld [vmem:[#allocation8 + $0xc4] ss:$8 sps:$4 sm:$0xff]  }
  0xeb   :  { %1571 = vmatpush2.bf16.msra.mxu1 %v2882_v59  ;;  %1535 = vmatprep.subr.bf16.mxu0 %v2893_v62  ;;  %v2998_v59 = vld [vmem:[#allocation8 + $0x104] ss:$8 sps:$4 sm:$0xff]   ;;  %v2960_v62 = vld [vmem:[#allocation8 + $0xc0] ss:$8 sps:$4 sm:$0xff]  }
  0xec   :  { %1572 = vmatprep.subr.bf16.mxu1 %v2890_v61  ;;  %v2996_v61 = vld [vmem:[#allocation8 + $0x100] ss:$8 sps:$4 sm:$0xff]  }
  0xee   :  { %1536 = vmatpush2.bf16.msra.mxu0 %v2891_v0  ;;  %v2965_v0 = vld [vmem:[#allocation8 + $0xb4] ss:$8 sps:$4 sm:$0xff]  }
  0xef   :  { %1573 = vmatpush2.bf16.msra.mxu1 %v2888_v63  ;;  %1537 = vmatprep.subr.bf16.mxu0 %v2899_v2  ;;  %v3001_v63 = vld [vmem:[#allocation8 + $0x1f4] ss:$8 sps:$4 sm:$0xff]   ;;  %v2963_v2 = vld [vmem:[#allocation8 + $0xb0] ss:$8 sps:$4 sm:$0xff]  }
  0xf0   :  { %1574 = vmatprep.subr.bf16.mxu1 %v2896_v1  ;;  %v2999_v1 = vld [vmem:[#allocation8 + $0x1f0] ss:$8 sps:$4 sm:$0xff]  }
  0xf2   :  { %1538 = vmatpush2.bf16.msra.mxu0 %v2897_v4  ;;  %v2968_v4 = vld [vmem:[#allocation8 + $0xa4] ss:$8 sps:$4 sm:$0xff]  }
  0xf3   :  { %1575 = vmatpush2.bf16.msra.mxu1 %v2894_v3  ;;  %1539 = vmatprep.subr.bf16.mxu0 %v2905_v6  ;;  %v3004_v3 = vld [vmem:[#allocation8 + $0x1e4] ss:$8 sps:$4 sm:$0xff]   ;;  %v2966_v6 = vld [vmem:[#allocation8 + $0xa0] ss:$8 sps:$4 sm:$0xff]  }
  0xf4   :  { %1576 = vmatprep.subr.bf16.mxu1 %v2902_v5  ;;  %v3002_v5 = vld [vmem:[#allocation8 + $0x1e0] ss:$8 sps:$4 sm:$0xff]  }
  0xf6   :  { %1540 = vmatpush2.bf16.msra.mxu0 %v2903_v10  ;;  %v2969_v10 = vld [vmem:[#allocation8 + $0x90] ss:$8 sps:$4 sm:$0xff]  }
  0xf7   :  { %1577 = vmatpush2.bf16.msra.mxu1 %v2900_v7  ;;  %1541 = vmatprep.subr.bf16.mxu0 %v2911_v12  ;;  %v2971_v7 = vld [vmem:[#allocation8 + $0x94] ss:$8 sps:$4 sm:$0xff]   ;;  %v2972_v12 = vld [vmem:[#allocation8 + $0x80] ss:$8 sps:$4 sm:$0xff]  }
  0xf8   :  { %1578 = vmatprep.subr.bf16.mxu1 %v2908_v11  ;;  %v2974_v11 = vld [vmem:[#allocation8 + $0x84] ss:$8 sps:$4 sm:$0xff]  }
  0xfa   :  { %1542 = vmatpush2.bf16.msra.mxu0 %v2909_v14 }
  0xfb   :  { %1579 = vmatpush2.bf16.msra.mxu1 %v2906_v13  ;;  %1543 = vmatprep.subr.bf16.mxu0 %v2917_v17  ;;  %v3005_v17 = vld [vmem:[#allocation8 + $0x1d0] ss:$8 sps:$4 sm:$0xff]  }
  0xfc   :  { %1580 = vmatprep.subr.bf16.mxu1 %v2914_v15  ;;  %v3007_v15 = vld [vmem:[#allocation8 + $0x1d4] ss:$8 sps:$4 sm:$0xff]  }
  0xfe   :  { %1544 = vmatpush2.bf16.msra.mxu0 %v2915_v21 }
  0xff   :  { %1581 = vmatpush2.bf16.msra.mxu1 %v2912_v18  ;;  %2040 = vmatprep.subr.bf16.mxu0 %v2929_v23  ;;  %v3010_v23 = vld [vmem:[#allocation8 + $0x1c4] ss:$8 sps:$4 sm:$0xff]  }
 0x100   :  { %1582 = vmatprep.subr.bf16.mxu1 %v2920_v22  ;;  %v3008_v22 = vld [vmem:[#allocation8 + $0x1c0] ss:$8 sps:$4 sm:$0xff]  }
 0x101   :  { %1546 = vmatmul.mubr.bf16.vlgmr.msra.gmra.mxu0 %v3243_v9  ;;  %v2936_v9 = vld [vmem:[#allocation8 + $0x40] ss:$8 sps:$4 sm:$0xff]  }
 0x102   :  { %2041 = vmatpush1.bf16.msra.mxu0 %v2927_v25 }
 0x103   :  { %1583 = vmatpush2.bf16.msra.mxu1 %v2918_v24  ;;  %2042 = vmatprep.subr.bf16.mxu0 %v2932_v27 }
 0x104   :  { %1584 = vmatprep.subr.bf16.mxu1 %v2923_v26 }
 0x106   :  { %2043 = vmatpush1.bf16.msra.mxu0 %v2930_v29  ;;  %v3013_v29 = vld [vmem:[#allocation8 + $0x1b4] ss:$8 sps:$4 sm:$0xff]  }
 0x107   :  { %1585 = vmatpush2.bf16.msra.mxu1 %v2921_v28  ;;  %2044 = vmatprep.subr.bf16.mxu0 %v2935_v31 }
 0x108   :  { %1609 = vmatprep.subr.bf16.mxu1 %v2926_v30  ;;  %v3011_v30 = vld [vmem:[#allocation8 + $0x1b0] ss:$8 sps:$4 sm:$0xff]  }
 0x10a   :  { %1587 = vmatmul.mubr.bf16.vlgmr.msra.gmra.mxu1 %v3256_v20  ;;  %2045 = vmatpush1.bf16.msra.mxu0 %v2933_v33  ;;  %v2978_v20 = vld [vmem:[#allocation8 + $0x160] ss:$8 sps:$4 sm:$0xff]   ;;  %v3016_v33 = vld [vmem:[#allocation8 + $0x1a4] ss:$8 sps:$4 sm:$0xff]  }
 0x10b   :  { %1610 = vmatpush1.bf16.msra.mxu1 %v2924_v32  ;;  %1627 = vmatprep.mubr.bf16.mxu1 %v3178_v16  ;;  %v2983_v16 = vld [vmem:[#allocation8 + $0x154] ss:$8 sps:$4 sm:$0xff]  }
 0x10c   :  { %2046 = vmatprep.subr.bf16.mxu0 %v2938_v34  ;;  %2081 = vmatprep.subr.bf16.mxu1 %v2977_v38  ;;  %v3014_v34 = vld [vmem:[#allocation8 + $0x1a0] ss:$8 sps:$4 sm:$0xff]  }
 0x10d   :  { %v3020_v38 = vld [vmem:[#allocation8 + $0x180] ss:$8 sps:$4 sm:$0xff]  }
 0x10e   :  { %2047 = vmatpush1.bf16.msra.mxu0 %v2936_v9 }
 0x10f   :  { %2048 = vmatprep.subr.bf16.mxu0 %v2941_v35  ;;  %v3019_v35 = vld [vmem:[#allocation8 + $0x194] ss:$8 sps:$4 sm:$0xff]  }
 0x112   :  { %2516 = vmatmul.mubr.msk.bf16.vlgmr.msra.gmra.mxu1 %vm1304_vm0, %v3248_v19  ;;  %2049 = vmatpush1.bf16.msra.mxu0 %v2939_v37  ;;  %v2948_v19 = vld [vmem:[#allocation8] ss:$8 sps:$4 sm:$0xff]   ;;  %v3017_v37 = vld [vmem:[#allocation8 + $0x190] ss:$8 sps:$4 sm:$0xff]  }
 0x113   :  { %2082 = vmatpush1.bf16.msra.mxu1 %v2975_v52  ;;  %2050 = vmatprep.subr.bf16.mxu0 %v2944_v39  ;;  %v3022_v52 = vld [vmem:[#allocation8 + $0x184] ss:$8 sps:$4 sm:$0xff]   ;;  %v304_v39 = vlaneseq }
 0x114   :  { %2083 = vmatprep.subr.bf16.mxu1 %v2980_v40 }
 0x115   :  { %v3267_v40 = vshrl.u32 %v304_v39, 7  ;;  %v3032_v39 = vld [vmem:[#allocation10 + $0x18] sm:$0xff]  }
 0x116   :  { %2051 = vmatpush1.bf16.msra.mxu0 %v2942_v8  ;;  %v302_v8 = vld [vmem:[#allocation7] sm:$0xf] }
 0x117   :  { %2084 = vmatpush1.bf16.msra.mxu1 %v2978_v20  ;;  %2052 = vmatprep.subr.bf16.mxu0 %v2947_v41  ;;  %v306_v20 = vsub.s32 0, %v3267_v40 }
 0x118   :  { %2085 = vmatprep.subr.bf16.mxu1 %v2983_v16  ;;  %v310_v16 = vsub.s32 1, %v3267_v40 }
 0x119   :  { %v307_v41 = vrot.slane %v302_v8, %v306_v20 }
 0x11a   :  { %2053 = vmatpush1.bf16.msra.mxu0 %v2945_v43 }
 0x11b   :  { %2086 = vmatpush1.bf16.msra.mxu1 %v2981_v42  ;;  %2054 = vmatprep.subr.bf16.mxu0 %v2950_v36  ;;  %v311_v42 = vrot.slane %v302_v8, %v310_v16 }
 0x11c   :  { %2087 = vmatprep.subr.bf16.mxu1 %v2986_v44 }
 0x11e   :  { %2055 = vmatpush1.bf16.msra.mxu0 %v2948_v19 }
 0x11f   :  { %2088 = vmatpush1.bf16.msra.mxu1 %v2984_v45  ;;  %2056 = vmatprep.subr.bf16.mxu0 %v2953_v47 }
 0x120   :  { %2089 = vmatprep.subr.bf16.mxu1 %v2989_v46 }
 0x122   :  { %2057 = vmatpush2.bf16.msra.mxu0 %v2951_v49 }
 0x123   :  { %2090 = vmatpush1.bf16.msra.mxu1 %v2987_v48  ;;  %2058 = vmatprep.subr.bf16.mxu0 %v2956_v51 }
 0x124   :  { %2091 = vmatprep.subr.bf16.mxu1 %v2992_v50 }
 0x126   :  { %2059 = vmatpush2.bf16.msra.mxu0 %v2954_v54 }
 0x127   :  { %2092 = vmatpush1.bf16.msra.mxu1 %v2990_v53  ;;  %2060 = vmatprep.subr.bf16.mxu0 %v2959_v56 }
 0x128   :  { %2093 = vmatprep.subr.bf16.mxu1 %v2995_v55 }
 0x12a   :  { %2061 = vmatpush2.bf16.msra.mxu0 %v2957_v58 }
 0x12b   :  { %2094 = vmatpush1.bf16.msra.mxu1 %v2993_v57  ;;  %2062 = vmatprep.subr.bf16.mxu0 %v2962_v60 }
 0x12c   :  { %2095 = vmatprep.subr.bf16.mxu1 %v2998_v59 }
 0x12e   :  { %2063 = vmatpush2.bf16.msra.mxu0 %v2960_v62 }
 0x12f   :  { %2096 = vmatpush1.bf16.msra.mxu1 %v2996_v61  ;;  %2064 = vmatprep.subr.bf16.mxu0 %v2965_v0  ;;  %v314_v0 = vsub.s32 2, %v3267_v40 }
 0x130   :  { %2097 = vmatprep.subr.bf16.mxu1 %v3001_v63 }
 0x132   :  { %2065 = vmatpush2.bf16.msra.mxu0 %v2963_v2  ;;  %v318_v2 = vsub.s32 3, %v3267_v40  ;;  %v2581_v40 = vld [vmem:[%s3296_s6] ss:$0 sm:$0xff] }
 0x133   :  { %2098 = vmatpush2.bf16.msra.mxu1 %v2999_v1  ;;  %2066 = vmatprep.subr.bf16.mxu0 %v2968_v4  ;;  %v315_v4 = vrot.slane %v302_v8, %v314_v0 }
 0x134   :  { %2099 = vmatprep.subr.bf16.mxu1 %v3004_v3 }
 0x136   :  { %2067 = vmatpush2.bf16.msra.mxu0 %v2966_v6  ;;  %v319_v6 = vrot.slane %v302_v8, %v318_v2  ;;  %v3033_v8 = vld [vmem:[#allocation10 + $0x50] sm:$0xff]  }
 0x137   :  { %2100 = vmatpush2.bf16.msra.mxu1 %v3002_v5  ;;  %2068 = vmatprep.subr.bf16.mxu0 %v2971_v7 }
 0x138   :  { %2101 = vmatprep.subr.bf16.mxu1 %v3007_v15 }
 0x13a   :  { %2069 = vmatpush2.bf16.msra.mxu0 %v2969_v10 }
 0x13b   :  { %2070 = vmatprep.subr.bf16.mxu0 %v2974_v11  ;;  %2102 = vmatpush2.bf16.msra.mxu1 %v3005_v17 }
 0x13c   :  { %2103 = vmatprep.subr.bf16.mxu1 %v3010_v23 }
 0x13e   :  { %2071 = vmatpush2.bf16.msra.mxu0 %v2972_v12 }
 0x13f   :  { %2104 = vmatpush2.bf16.msra.mxu1 %v3008_v22 }
 0x140   :  { %2105 = vmatprep.subr.bf16.mxu1 %v3013_v29 }
 0x141   :  { %v1342_v13 = vpop.f32.mrf.mxu0 }
 0x142   :  { %v1383_v14 = vpop.f32.mrf.mxu1  ;;  %v1343_v43 = vadd.f32 %v1342_v13, %v307_v41  ;;  %v3034_v41 = vld [vmem:[#allocation10 + $0x10] sm:$0xff]  }
 0x143   :  { %v1344_v18 = vpop.f32.mrf.mxu0  ;;  %2106 = vmatpush2.bf16.msra.mxu1 %v3011_v30 }
 0x144   :  { %v1385_v21 = vpop.f32.mrf.mxu1  ;;  %2107 = vmatprep.subr.bf16.mxu1 %v3016_v33  ;;  %v1345_v44 = vadd.f32 %v1344_v18, %v311_v42  ;;  %v1384_v36 = vadd.f32 %v1383_v14, %v1343_v43  ;;  %v3027_v33 = vld [vmem:[#allocation10 + $0x68] sm:$0xff]  }
 0x145   :  { %v1346_v25 = vpop.f32.mrf.mxu0  ;;  %v3035_v42 = vld [vmem:[#allocation10 + $0x48] sm:$0xff]  }
 0x146   :  { %v1387_v24 = vpop.f32.mrf.mxu1  ;;  %v1386_v19 = vadd.f32 %v1385_v21, %v1345_v44  ;;  %v3024_v25 = vld [vmem:[#allocation10 + $0x38] sm:$0xff]   ;;  %v3036_v43 = vld [vmem:[#allocation10 + $0x8] sm:$0xff]   ;;  %v3037_v44 = vld [vmem:[#allocation10 + $0x40] sm:$0xff]  }
 0x147   :  { %v1347_v27 = vpop.f32.mrf.mxu0  ;;  %2108 = vmatpush2.bf16.msra.mxu1 %v3014_v34  ;;  %v3023_v24 = vld [vmem:[#allocation10 + $0x78] sm:$0xff]  }
 0x148   :  { %v1388_v26 = vpop.f32.mrf.mxu1  ;;  %2109 = vmatprep.subr.bf16.mxu1 %v3019_v35  ;;  %2598 = vmatprep.subr.bf16.mxu0 %v3023_v24  ;;  %v3028_v35 = vld [vmem:[#allocation10 + $0x28] sm:$0xff]  }
 0x149   :  { %v3025_v26 = vld [vmem:[#allocation10 + $0x70] sm:$0xff]  }
 0x14a   :  { %v1465_v28 = vpop.f32.mrf.mxu1 }
 0x14b   :  { %2110 = vmatpush2.bf16.msra.mxu1 %v3017_v37  ;;  %v3029_v37 = vld [vmem:[#allocation10 + $0x60] sm:$0xff]  }
 0x14c   :  { %v1467_v31 = vpop.f32.mrf.mxu1  ;;  %2111 = vmatprep.subr.bf16.mxu1 %v3022_v52  ;;  %v3030_v52 = vld [vmem:[#allocation10 + $0x20] sm:$0xff]  }
 0x14e   :  { %v1469_v32 = vpop.f32.mrf.mxu1 }
 0x14f   :  { %2112 = vmatpush2.bf16.msra.mxu1 %v3020_v38  ;;  %v3031_v38 = vld [vmem:[#allocation10 + $0x58] sm:$0xff]  }
 0x150   :  { %v1470_v9 = vpop.f32.mrf.mxu1 }
 0x181   :  { %v1424_v45 = vpop.f32.mrf.mxu0 }
 0x182   :  { %v1425_v46 = vadd.f32 %v1424_v45, %v1384_v36  ;;  %v3038_v36 = vld [vmem:[#allocation10] sm:$0xff]  }
 0x183   :  { %v1426_v47 = vpop.f32.mrf.mxu0 }
 0x184   :  { %v1466_v48 = vadd.f32 %v1465_v28, %v1425_v46  ;;  %v1427_v49 = vadd.f32 %v1426_v47, %v1386_v19 }
 0x185   :  { %v1428_v50 = vpop.f32.mrf.mxu0 }
 0x186   :  { %v1468_v51 = vadd.f32 %v1467_v31, %v1427_v49  ;;  %v1636_v53 = vmax.f32 %v1466_v48, 0.0  ;;  %v3026_v31 = vld [vmem:[#allocation10 + $0x30] sm:$0xff]   ;;  %v1708_v48 = vld [vmem:[%s3294_s4] sm:$0x3] }
 0x187   :  { %v1429_v54 = vpop.f32.mrf.mxu0  ;;  %v1713_v49 = vrot.slane %v1708_v48, %v306_v20  ;;  %v1717_v50 = vrot.slane %v1708_v48, %v310_v16 }
 0x188   :  { %v1637_v55 = vmax.f32 %v1468_v51, 0.0  ;;  %v1640_v58 = vpack.c.bf16 %v1636_v53, %v1636_v53 }
 0x18a   :  { %v1506_v56 = vpop.f32.mrf.mxu1  ;;  %v1641_v57 = vpack.c.bf16 %v1637_v55, %v1637_v55 }
 0x18b   :  { %v1507_v10 = vadd.f32 %v1506_v56, %v315_v4 }
 0x18c   :  { %v1508_v59 = vpop.f32.mrf.mxu1  ;;  %2072 = vmatprep.mubr.bf16.mxu0 %v1641_v57 }
 0x18d   :  { %2073 = vmatmul.mubr.bf16.vlgmr.msra.gmra.mxu0 %v1640_v58  ;;  %v1509_v12 = vadd.f32 %v1508_v59, %v319_v6 }
 0x18e   :  { %v1510_v60 = vpop.f32.mrf.mxu1  ;;  %2599 = vmatpush3.bf16.msra.mxu0 %v3024_v25 }
 0x18f   :  { %2600 = vmatprep.subr.bf16.mxu0 %v3025_v26 }
 0x190   :  { %v1511_v61 = vpop.f32.mrf.mxu1 }
 0x192   :  { %2601 = vmatpush3.bf16.msra.mxu0 %v3026_v31 }
 0x193   :  { %2602 = vmatprep.subr.bf16.mxu0 %v3027_v33 }
 0x196   :  { %2603 = vmatpush3.bf16.msra.mxu0 %v3028_v35 }
 0x197   :  { %2604 = vmatprep.subr.bf16.mxu0 %v3029_v37 }
 0x19a   :  { %2605 = vmatpush3.bf16.msra.mxu0 %v3030_v52 }
 0x19b   :  { %2606 = vmatprep.subr.bf16.mxu0 %v3031_v38 }
 0x19e   :  { %2607 = vmatpush3.bf16.msra.mxu0 %v3032_v39 }
 0x19f   :  { %2608 = vmatprep.subr.bf16.mxu0 %v3033_v8 }
 0x1a2   :  { %2609 = vmatpush3.bf16.msra.mxu0 %v3034_v41 }
 0x1a3   :  { %2610 = vmatprep.subr.bf16.mxu0 %v3035_v42 }
 0x1a6   :  { %2611 = vmatpush3.bf16.msra.mxu0 %v3036_v43 }
 0x1a7   :  { %2612 = vmatprep.subr.bf16.mxu0 %v3037_v44 }
 0x1aa   :  { %2613 = vmatpush3.bf16.msra.mxu0 %v3038_v36 }
 0x1c1   :  { %v1547_v62 = vpop.f32.mrf.mxu0 }
 0x1c2   :  { %v1548_v13 = vadd.f32 %v1547_v62, %v1507_v10 }
 0x1c3   :  { %v1549_v63 = vpop.f32.mrf.mxu0 }
 0x1c4   :  { %v1550_v15 = vadd.f32 %v1549_v63, %v1509_v12 }
 0x1c5   :  { %v1551_v1 = vpop.f32.mrf.mxu0 }
 0x1c7   :  { %v1552_v3 = vpop.f32.mrf.mxu0 }
 0x1ca   :  { %v1588_v5 = vpop.f32.mrf.mxu1 }
 0x1cb   :  { %v1589_v17 = vadd.f32 %v1588_v5, %v1548_v13 }
 0x1cc   :  { %v1590_v7 = vpop.f32.mrf.mxu1 }
 0x1cd   :  { %v1591_v21 = vadd.f32 %v1590_v7, %v1550_v15 }
 0x1ce   :  { %v1592_v11 = vpop.f32.mrf.mxu1 }
 0x1d0   :  { %v1593_v14 = vpop.f32.mrf.mxu1 }
 0x1d2   :  { %v1629_v18 = vpop.f32.mrf.mxu1 }
 0x1d3   :  { %v1630_v22 = vadd.f32 %v1629_v18, %v1589_v17 }
 0x1d4   :  { %v1631_v23 = vpop.f32.mrf.mxu1 }
 0x1d5   :  { %v1632_v27 = vadd.f32 %v1631_v23, %v1591_v21  ;;  %v1638_v28 = vmax.f32 %v1630_v22, 0.0 }
 0x1d6   :  { %v1633_v29 = vpop.f32.mrf.mxu1 }
 0x1d7   :  { %v1639_v30 = vmax.f32 %v1632_v27, 0.0  ;;  %v1642_v9 = vpack.c.bf16 %v1638_v28, %v1638_v28 }
 0x1d8   :  { %v1634_v32 = vpop.f32.mrf.mxu1 }
 0x1d9   :  { %v1643_v34 = vpack.c.bf16 %v1639_v30, %v1639_v30 }
 0x1db   :  { %2113 = vmatprep.mubr.bf16.mxu1 %v1643_v34 }
 0x1dc   :  { %2114 = vmatmul.mubr.bf16.vlgmr.msra.gmra.mxu1 %v1642_v9 }
 0x24d   :  { %v2074_v45 = vpop.f32.mrf.mxu0 }
 0x24e   :  { %v2075_v51 = vadd.f32 %v2074_v45, %v1713_v49 }
 0x24f   :  { %v2076_v19 = vpop.f32.mrf.mxu0 }
 0x250   :  { %v2077_v54 = vadd.f32 %v2076_v19, %v1717_v50 }
 0x251   :  { %v2078_v46 = vpop.f32.mrf.mxu0 }
 0x253   :  { %v2079_v47 = vpop.f32.mrf.mxu0 }
 0x29c   :  { %v2115_v53 = vpop.f32.mrf.mxu1 }
 0x29d   :  { %v2116_v55 = vadd.f32 %v2115_v53, %v2075_v51 }
 0x29e   :  { %v2117_v56 = vpop.f32.mrf.mxu1 }
 0x29f   :  { %v2118_v57 = vadd.f32 %v2117_v56, %v2077_v54  ;;  %v2122_v58 = vmax.f32 %v2116_v55, 0.0 }
 0x2a0   :  { %v2119_v59 = vpop.f32.mrf.mxu1 }
 0x2a1   :  { %v2123_v60 = vmax.f32 %v2118_v57, 0.0  ;;  %v2124_v63 = vpack.c.bf16 %v2122_v58, %v2122_v58 }
 0x2a2   :  { %v2120_v61 = vpop.f32.mrf.mxu1 }
 0x2a3   :  { %v2125_v62 = vpack.c.bf16 %v2123_v60, %v2123_v60 }
 0x2a5   :  { %2293 = vmatprep.mubr.bf16.mxu0 %v2125_v62 }
 0x2a6   :  { %2294 = vmatmul.mubr.bf16.vlgmr.msra.gmra.mxu0 %v2124_v63 }
 0x366   :  { %v2614_v0 = vpop.f32.mrf.mxu0 }
 0x368   :  { %v2615_v20 = vpop.f32.mrf.mxu0 }
 0x369   :  { %v2616_v16 = vadd.f32 %v2615_v20, %v2614_v0 }
 0x36a   :  { %v2617_v1 = vpop.f32.mrf.mxu0 }
 0x36b   :  { %v2296_v2 = vadd.f32 %v2616_v16, %v2581_v40 }
 0x36c   :  { %v2618_v3 = vpop.f32.mrf.mxu0 }
 0x36d   :  { %2301 = vst [vmem:[#allocation11] sm:$0xff] %v2296_v2 }
 0x36e   :  { %3150 = shalt.err (!%p3147_p1)
}
 0x36f   :  { %2311 = dma.vmem_to_hbm [thread:$0]  %s2309_s8, 128, %s3297_s7, [#allocation4]  }
 0x370   :  { %3165 = dma.done.wait [#allocation4], 128  }
 0x371   :  { %3166 = vsyncadd [#allocation4], 4294967168 }
 0x372   :  { %2315 = vsyncpa [#allocation3], 1 }
 0x373   :  { %2316 = vsyncpa [#allocation6], 1 }
 0x374   :  { %2317 = vsyncpa [#allocation9], 1 }
 0x375   :  { %2318 = vsyncpa [#allocation4], 1 }

// kernel: tpu_custom_call.1
= control target key start
LH: loop header
LB: loop body
LE: loop exit
PB: predicated region body
PF: predicated region fallthrough
CT: control target
= control target key end

     0   :  { %12 = vsyncpa [#allocation3], 0  ;;  %s3290_s0 = inlined_call_operand.hbm [shape: f32[8,784], index: 0, kind: input, shape index: {}]   ;;  %s3291_s1 = inlined_call_operand.hbm [shape: bf16[784,512], index: 1, kind: input, shape index: {}]   ;;  %s3292_s2 = inlined_call_operand.hbm [shape: f32[1,512], index: 2, kind: input, shape index: {}]   ;;  %s3293_s3 = inlined_call_operand.hbm [shape: bf16[512,256], index: 3, kind: input, shape index: {}]   ;;  %s3294_s4 = inlined_call_operand.vmem [shape: f32[1,256], index: 4, kind: input, shape index: {}]   ;;  %s3295_s5 = inlined_call_operand.hbm [shape: bf16[256,128], index: 5, kind: input, shape index: {}]   ;;  %s3296_s6 = inlined_call_operand.vmem [shape: f32[1,128], index: 6, kind: input, shape index: {}]   ;;  %s3297_s7 = inlined_call_operand.hbm [shape: f32[8,128], index: 7, kind: output, shape index: {}]  }
   0x1   :  { %13 = vsyncpa [#allocation6], 0 }
   0x2   :  { %14 = vsyncpa [#allocation9], 0 }
   0x3   :  { %15 = vsyncpa [#allocation4], 0  ;;  %s3167_s24 = smov [#allocation5]  }
   0x4   :  { %s31_s25 = sshll.u32 %s3167_s24, 4  ;;  %s32_s25 = int_to_ptr.vmem [resolvable:$true] %s31_s25 }
   0x5   :  { %s3047_s26 = scalar_lea.vmem %s32_s25, 25088  ;;  %p3052_p1 = scmp.lt.s32.totalorder %s32_s25, %s32_s25 }
   0x6   :  { %p3048_p0 = scmp.ne.s32.totalorder %s32_s25, %s3047_s26  ;;  %p3053_p2 = scmp.lt.s32.totalorder %s3047_s26, %s3047_s26 }
   0x8   :  { %p3054_p3 = por %p3053_p2, %p3052_p1 }
   0xa   :  { %p3055_p4 = pnand %p3054_p3, %p3048_p0 }
   0xc   :  { %3058 = shalt.err (!%p3055_p4)
}
   0xd   :  { %s3168_s27 = smov 256   ;;  %s3169_s28 = smov 16  }
   0xe   :  { %37 = dma.hbm_to_vmem [thread:$0]  %s3291_s1, 25088, %s32_s25, [#allocation6], %s3168_s27, %s3168_s27, %s3169_s28  }
   0xf   :  { %s3170_s8 = smov [#allocation8]  }
  0x10   :  { %s53_s9 = sshll.u32 %s3170_s8, 4  ;;  %s54_s9 = int_to_ptr.vmem [resolvable:$true] %s53_s9 }
  0x11   :  { %s3067_s10 = scalar_lea.vmem %s54_s9, 8192  ;;  %p3072_p6 = scmp.lt.s32.totalorder %s54_s9, %s54_s9 }
  0x12   :  { %p3068_p5 = scmp.ne.s32.totalorder %s54_s9, %s3067_s10  ;;  %p3073_p7 = scmp.lt.s32.totalorder %s3067_s10, %s3067_s10 }
  0x14   :  { %p3074_p8 = por %p3073_p7, %p3072_p6 }
  0x16   :  { %p3075_p9 = pnand %p3074_p8, %p3068_p5 }
  0x18   :  { %3078 = shalt.err (!%p3075_p9)
}
  0x19   :  { %s3171_s11 = smov 128   ;;  %s3172_s12 = smov 8  }
  0x1a   :  { %59 = dma.hbm_to_vmem [thread:$0]  %s3293_s3, 8192, %s54_s9, [#allocation9], %s3171_s11, %s3171_s11, %s3172_s12  }
  0x1b   :  { %s3173_s15 = smov [#allocation2]   ;;  %s3174_s17 = smov [#allocation7]  }
  0x1c   :  { %s22_s16 = sshll.u32 %s3173_s15, 4  ;;  %s44_s1 = sshll.u32 %s3174_s17, 4  ;;  %s23_s16 = int_to_ptr.vmem [resolvable:$true] %s22_s16  ;;  %s45_s1 = int_to_ptr.vmem [resolvable:$true] %s44_s1 }
  0x1d   :  { %s3087_s18 = scalar_lea.vmem %s23_s16, 896  ;;  %p3092_p11 = scmp.lt.s32.totalorder %s23_s16, %s23_s16 }
  0x1e   :  { %p3088_p10 = scmp.ne.s32.totalorder %s23_s16, %s3087_s18  ;;  %p3093_p12 = scmp.lt.s32.totalorder %s3087_s18, %s3087_s18 }
  0x20   :  { %p3094_p13 = por %p3093_p12, %p3092_p11 }
  0x22   :  { %p3095_p0 = pnand %p3094_p13, %p3088_p10 }
  0x24   :  { %3098 = shalt.err (!%p3095_p0)
}
  0x25   :  { %25 = dma.hbm_to_vmem [thread:$0]  %s3290_s0, 896, %s23_s16, [#allocation3]  }
  0x26   :  { %s3107_s21 = scalar_lea.vmem %s45_s1, 64  ;;  %p3112_p2 = scmp.lt.s32.totalorder %s45_s1, %s45_s1 }
  0x27   :  { %p3108_p1 = scmp.ne.s32.totalorder %s45_s1, %s3107_s21  ;;  %p3113_p3 = scmp.lt.s32.totalorder %s3107_s21, %s3107_s21 }
  0x29   :  { %p3114_p4 = por %p3113_p3, %p3112_p2 }
  0x2b   :  { %p3115_p5 = pnand %p3114_p4, %p3108_p1 }
  0x2d   :  { %3118 = shalt.err (!%p3115_p5)
}
  0x2e   :  { %47 = dma.hbm_to_vmem [thread:$0]  %s3292_s2, 64, %s45_s1, [#allocation6]  }
  0x2f   :  { %s3175_s23 = smov [#allocation10]  }
  0x30   :  { %s67_s24 = sshll.u32 %s3175_s23, 4  ;;  %s68_s24 = int_to_ptr.vmem [resolvable:$true] %s67_s24 }
  0x31   :  { %s3127_s25 = scalar_lea.vmem %s68_s24, 2048  ;;  %p3132_p7 = scmp.lt.s32.totalorder %s68_s24, %s68_s24 }
  0x32   :  { %p3128_p6 = scmp.ne.s32.totalorder %s68_s24, %s3127_s25  ;;  %p3133_p8 = scmp.lt.s32.totalorder %s3127_s25, %s3127_s25 }
  0x34   :  { %p3134_p9 = por %p3133_p8, %p3132_p7 }
  0x36   :  { %p3135_p10 = pnand %p3134_p9, %p3128_p6 }
  0x38   :  { %3138 = shalt.err (!%p3135_p10)
}
  0x39   :  { %s3176_s0 = smov 64   ;;  %s3177_s26 = smov 4  }
  0x3a   :  { %73 = dma.hbm_to_vmem [thread:$0]  %s3295_s5, 2048, %s68_s24, [#allocation9], %s3176_s0, %s3176_s0, %s3177_s26  }
  0x3b   :  { %3159 = dma.done.wait [#allocation3], 896  }
  0x3c   :  { %3160 = vsyncadd [#allocation3], 4294966400 }
  0x3d   :  { %3161 = dma.done.wait [#allocation6], 25152  }
  0x3e   :  { %3162 = vsyncadd [#allocation6], 4294942144 }
  0x3f   :  { %3163 = dma.done.wait [#allocation9], 10240  }
  0x40   :  { %3164 = vsyncadd [#allocation9], 4294957056  ;;  %v2633_v0 = vld [vmem:[#allocation5 + $0xe4] ss:$16 sps:$4 sm:$0xff]   ;;  %v2637_v2 = vld [vmem:[#allocation5 + $0xe0] ss:$16 sps:$4 sm:$0xff]  }
  0x41   :  { %v2635_v1 = vld [vmem:[#allocation5 + $0x2e4] ss:$16 sps:$4 sm:$0xff]   ;;  %1308 = vmatprep.subr.bf16.mxu0 %v2633_v0  ;;  %v2638_v3 = vld [vmem:[#allocation5 + $0x2e0] ss:$16 sps:$4 sm:$0xff]   ;;  %vm1304_vm0 = vcmask 130048   ;;  %s3179_s30 = smov [#allocation11]  }
  0x42   :  { %1349 = vmatprep.subr.bf16.mxu1 %v2635_v1  ;;  %v2639_v4 = vld [vmem:[#allocation5 + $0xc4] ss:$16 sps:$4 sm:$0xff]   ;;  %1309 = vmatpush1.bf16.msra.mxu0 %v2637_v2  ;;  %v2643_v6 = vld [vmem:[#allocation5 + $0xc0] ss:$16 sps:$4 sm:$0xff]   ;;  %s2308_s8 = sshll.u32 %s3179_s30, 4  ;;  %s2309_s8 = int_to_ptr.vmem [resolvable:$true] %s2308_s8 }
  0x43   :  { %1350 = vmatpush1.bf16.msra.mxu1 %v2638_v3  ;;  %v2641_v5 = vld [vmem:[#allocation5 + $0x2c4] ss:$16 sps:$4 sm:$0xff]   ;;  %1310 = vmatprep.subr.bf16.mxu0 %v2639_v4  ;;  %v2644_v7 = vld [vmem:[#allocation5 + $0x2c0] ss:$16 sps:$4 sm:$0xff]   ;;  %v92_v4 = vld [vmem:[#allocation2] sm:$0xff]  ;;  %s3139_s9 = scalar_lea.vmem %s2309_s8, 128  ;;  %p3144_p12 = scmp.lt.s32.totalorder %s2309_s8, %s2309_s8 }
  0x44   :  { %1351 = vmatprep.subr.bf16.mxu1 %v2641_v5  ;;  %v2645_v8 = vld [vmem:[#allocation5 + $0xa4] ss:$16 sps:$4 sm:$0xff]   ;;  %v2649_v10 = vld [vmem:[#allocation5 + $0xa0] ss:$16 sps:$4 sm:$0xff]   ;;  %v94_v5 = vld [vmem:[#allocation2 + $0x10] sm:$0xff]  ;;  %p3140_p11 = scmp.ne.s32.totalorder %s2309_s8, %s3139_s9  ;;  %p3145_p13 = scmp.lt.s32.totalorder %s3139_s9, %s3139_s9 }
  0x45   :  { %v2647_v9 = vld [vmem:[#allocation5 + $0x2a4] ss:$16 sps:$4 sm:$0xff]   ;;  %v2650_v11 = vld [vmem:[#allocation5 + $0x2a0] ss:$16 sps:$4 sm:$0xff]  }
  0x46   :  { %1311 = vmatpush1.bf16.msra.mxu0 %v2643_v6  ;;  %v2651_v12 = vld [vmem:[#allocation5 + $0x84] ss:$16 sps:$4 sm:$0xff]   ;;  %v2655_v14 = vld [vmem:[#allocation5 + $0x80] ss:$16 sps:$4 sm:$0xff]   ;;  %p3146_p0 = por %p3145_p13, %p3144_p12 }
  0x47   :  { %1352 = vmatpush1.bf16.msra.mxu1 %v2644_v7  ;;  %1312 = vmatprep.subr.bf16.mxu0 %v2645_v8  ;;  %v2653_v13 = vld [vmem:[#allocation5 + $0x284] ss:$16 sps:$4 sm:$0xff]   ;;  %v2656_v15 = vld [vmem:[#allocation5 + $0x280] ss:$16 sps:$4 sm:$0xff]   ;;  %v3241_v8 = vpack.c.bf16 %v92_v4, %v92_v4  ;;  %v2812_v4 = vld [vmem:[#allocation5 + $0x16c] ss:$16 sps:$4 sm:$0xff]  }
  0x48   :  { %1353 = vmatprep.subr.bf16.mxu1 %v2647_v9  ;;  %v2657_v16 = vld [vmem:[#allocation5 + $0x64] ss:$16 sps:$4 sm:$0xff]   ;;  %v2661_v18 = vld [vmem:[#allocation5 + $0x60] ss:$16 sps:$4 sm:$0xff]   ;;  %v3243_v9 = vpack.c.bf16 %v94_v5, %v94_v5  ;;  %p3147_p1 = pnand %p3146_p0, %p3140_p11 }
  0x49   :  { %v2659_v17 = vld [vmem:[#allocation5 + $0x264] ss:$16 sps:$4 sm:$0xff]   ;;  %v2662_v19 = vld [vmem:[#allocation5 + $0x260] ss:$16 sps:$4 sm:$0xff]  }
  0x4a   :  { %1313 = vmatpush1.bf16.msra.mxu0 %v2649_v10  ;;  %v2663_v20 = vld [vmem:[#allocation5 + $0x44] ss:$16 sps:$4 sm:$0xff]   ;;  %v2667_v22 = vld [vmem:[#allocation5 + $0x40] ss:$16 sps:$4 sm:$0xff]  }
  0x4b   :  { %1354 = vmatpush1.bf16.msra.mxu1 %v2650_v11  ;;  %1314 = vmatprep.subr.bf16.mxu0 %v2651_v12  ;;  %v2665_v21 = vld [vmem:[#allocation5 + $0x244] ss:$16 sps:$4 sm:$0xff]   ;;  %v2668_v23 = vld [vmem:[#allocation5 + $0x240] ss:$16 sps:$4 sm:$0xff]  }
  0x4c   :  { %1355 = vmatprep.subr.bf16.mxu1 %v2653_v13  ;;  %v2669_v24 = vld [vmem:[#allocation5 + $0x24] ss:$16 sps:$4 sm:$0xff]   ;;  %v2673_v26 = vld [vmem:[#allocation5 + $0x20] ss:$16 sps:$4 sm:$0xff]   ;;  %v2740_v13 = vld [vmem:[#allocation5 + $0xec] ss:$16 sps:$4 sm:$0xff]  }
  0x4d   :  { %v2671_v25 = vld [vmem:[#allocation5 + $0x224] ss:$16 sps:$4 sm:$0xff]   ;;  %v2674_v27 = vld [vmem:[#allocation5 + $0x220] ss:$16 sps:$4 sm:$0xff]  }
  0x4e   :  { %1315 = vmatpush1.bf16.msra.mxu0 %v2655_v14  ;;  %v2675_v28 = vld [vmem:[#allocation5 + $0x4] ss:$16 sps:$4 sm:$0xff]   ;;  %v2679_v30 = vld [vmem:[#allocation5] ss:$16 sps:$4 sm:$0xff]  }
  0x4f   :  { %1356 = vmatpush1.bf16.msra.mxu1 %v2656_v15  ;;  %1316 = vmatprep.subr.bf16.mxu0 %v2657_v16  ;;  %v2677_v29 = vld [vmem:[#allocation5 + $0x204] ss:$16 sps:$4 sm:$0xff]   ;;  %v2680_v31 = vld [vmem:[#allocation5 + $0x200] ss:$16 sps:$4 sm:$0xff]   ;;  %v98_v15 = vld [vmem:[#allocation2 + $0x30] sm:$0xff]  ;;  %v3178_v16 = vmov 0  }
  0x50   :  { %1357 = vmatprep.subr.bf16.mxu1 %v2659_v17  ;;  %v2681_v32 = vld [vmem:[#allocation5 + $0x1e4] ss:$16 sps:$4 sm:$0xff]   ;;  %v2685_v34 = vld [vmem:[#allocation5 + $0x1e0] ss:$16 sps:$4 sm:$0xff]  }
  0x51   :  { %v2683_v33 = vld [vmem:[#allocation5 + $0x3e4] ss:$16 sps:$4 sm:$0xff]   ;;  %v2686_v35 = vld [vmem:[#allocation5 + $0x3e0] ss:$16 sps:$4 sm:$0xff]  }
  0x52   :  { %1317 = vmatpush1.bf16.msra.mxu0 %v2661_v18  ;;  %v2687_v36 = vld [vmem:[#allocation5 + $0x1c4] ss:$16 sps:$4 sm:$0xff]   ;;  %v2691_v38 = vld [vmem:[#allocation5 + $0x1c0] ss:$16 sps:$4 sm:$0xff]   ;;  %v2738_v18 = vld [vmem:[#allocation5 + $0xe8] ss:$16 sps:$4 sm:$0xff]  }
  0x53   :  { %1358 = vmatpush1.bf16.msra.mxu1 %v2662_v19  ;;  %1318 = vmatprep.subr.bf16.mxu0 %v2663_v20  ;;  %v2689_v37 = vld [vmem:[#allocation5 + $0x3c4] ss:$16 sps:$4 sm:$0xff]   ;;  %v2692_v39 = vld [vmem:[#allocation5 + $0x3c0] ss:$16 sps:$4 sm:$0xff]   ;;  %v3248_v19 = vpack.c.bf16 %v98_v15, %v98_v15  ;;  %v96_v15 = vld [vmem:[#allocation2 + $0x20] sm:$0xff] }
  0x54   :  { %1359 = vmatprep.subr.bf16.mxu1 %v2665_v21  ;;  %v2693_v40 = vld [vmem:[#allocation5 + $0x1a4] ss:$16 sps:$4 sm:$0xff]   ;;  %v2697_v42 = vld [vmem:[#allocation5 + $0x1a0] ss:$16 sps:$4 sm:$0xff]   ;;  %v2746_v21 = vld [vmem:[#allocation5 + $0xcc] ss:$16 sps:$4 sm:$0xff]  }
  0x55   :  { %v2695_v41 = vld [vmem:[#allocation5 + $0x3a4] ss:$16 sps:$4 sm:$0xff]   ;;  %v2698_v43 = vld [vmem:[#allocation5 + $0x3a0] ss:$16 sps:$4 sm:$0xff]  }
  0x56   :  { %1319 = vmatpush1.bf16.msra.mxu0 %v2667_v22  ;;  %v2699_v44 = vld [vmem:[#allocation5 + $0x184] ss:$16 sps:$4 sm:$0xff]   ;;  %v2703_v47 = vld [vmem:[#allocation5 + $0x180] ss:$16 sps:$4 sm:$0xff]  }
  0x57   :  { %1360 = vmatpush1.bf16.msra.mxu1 %v2668_v23  ;;  %1320 = vmatprep.subr.bf16.mxu0 %v2669_v24  ;;  %v2701_v45 = vld [vmem:[#allocation5 + $0x384] ss:$16 sps:$4 sm:$0xff]   ;;  %v2704_v48 = vld [vmem:[#allocation5 + $0x380] ss:$16 sps:$4 sm:$0xff]   ;;  %v2744_v23 = vld [vmem:[#allocation5 + $0xc8] ss:$16 sps:$4 sm:$0xff]  }
  0x58   :  { %1361 = vmatprep.subr.bf16.mxu1 %v2671_v25  ;;  %v93_v46 = vld [vmem:[#allocation2 + $0x8] sm:$0xff]  ;;  %v95_v50 = vld [vmem:[#allocation2 + $0x18] sm:$0xff]  ;;  %v2752_v25 = vld [vmem:[#allocation5 + $0xac] ss:$16 sps:$4 sm:$0xff]  }
  0x59   :  { %v3235_v49 = vpack.c.bf16 %v93_v46, %v93_v46  ;;  %v2705_v51 = vld [vmem:[#allocation5 + $0x164] ss:$16 sps:$4 sm:$0xff]   ;;  %v3237_v52 = vpack.c.bf16 %v95_v50, %v95_v50  ;;  %v2709_v54 = vld [vmem:[#allocation5 + $0x160] ss:$16 sps:$4 sm:$0xff]  }
  0x5a   :  { %1321 = vmatpush1.bf16.msra.mxu0 %v2673_v26  ;;  %v2707_v53 = vld [vmem:[#allocation5 + $0x364] ss:$16 sps:$4 sm:$0xff]   ;;  %v2710_v55 = vld [vmem:[#allocation5 + $0x360] ss:$16 sps:$4 sm:$0xff]  }
  0x5b   :  { %1362 = vmatpush1.bf16.msra.mxu1 %v2674_v27  ;;  %1322 = vmatprep.subr.bf16.mxu0 %v2675_v28  ;;  %v2711_v56 = vld [vmem:[#allocation5 + $0x144] ss:$16 sps:$4 sm:$0xff]   ;;  %v2715_v58 = vld [vmem:[#allocation5 + $0x140] ss:$16 sps:$4 sm:$0xff]   ;;  %v2750_v27 = vld [vmem:[#allocation5 + $0xa8] ss:$16 sps:$4 sm:$0xff]  }
  0x5c   :  { %1363 = vmatprep.subr.bf16.mxu1 %v2677_v29  ;;  %1340 = vmatprep.mubr.bf16.mxu0 %v3235_v49  ;;  %v2713_v57 = vld [vmem:[#allocation5 + $0x344] ss:$16 sps:$4 sm:$0xff]   ;;  %v2716_v59 = vld [vmem:[#allocation5 + $0x340] ss:$16 sps:$4 sm:$0xff]   ;;  %v2758_v29 = vld [vmem:[#allocation5 + $0x8c] ss:$16 sps:$4 sm:$0xff]  }
  0x5d   :  { %1381 = vmatprep.mubr.bf16.mxu1 %v3237_v52  ;;  %v2717_v60 = vld [vmem:[#allocation5 + $0x124] ss:$16 sps:$4 sm:$0xff]   ;;  %v2721_v62 = vld [vmem:[#allocation5 + $0x120] ss:$16 sps:$4 sm:$0xff]  }
  0x5e   :  { %1323 = vmatpush1.bf16.msra.mxu0 %v2679_v30  ;;  %v2719_v61 = vld [vmem:[#allocation5 + $0x324] ss:$16 sps:$4 sm:$0xff]   ;;  %v2722_v63 = vld [vmem:[#allocation5 + $0x320] ss:$16 sps:$4 sm:$0xff]  }
  0x5f   :  { %1364 = vmatpush1.bf16.msra.mxu1 %v2680_v31  ;;  %1324 = vmatprep.subr.bf16.mxu0 %v2681_v32  ;;  %v2723_v0 = vld [vmem:[#allocation5 + $0x104] ss:$16 sps:$4 sm:$0xff]   ;;  %v2727_v2 = vld [vmem:[#allocation5 + $0x100] ss:$16 sps:$4 sm:$0xff]   ;;  %v2756_v31 = vld [vmem:[#allocation5 + $0x88] ss:$16 sps:$4 sm:$0xff]  }
  0x60   :  { %1365 = vmatprep.subr.bf16.mxu1 %v2683_v33  ;;  %v2725_v1 = vld [vmem:[#allocation5 + $0x304] ss:$16 sps:$4 sm:$0xff]   ;;  %v2728_v3 = vld [vmem:[#allocation5 + $0x300] ss:$16 sps:$4 sm:$0xff]   ;;  %v2764_v33 = vld [vmem:[#allocation5 + $0x6c] ss:$16 sps:$4 sm:$0xff]  }
  0x61   :  { %v2731_v6 = vld [vmem:[#allocation5 + $0x4e4] ss:$16 sps:$4 sm:$0xff]   ;;  %v2729_v10 = vld [vmem:[#allocation5 + $0x4e0] ss:$16 sps:$4 sm:$0xff]  }
  0x62   :  { %1325 = vmatpush2.bf16.msra.mxu0 %v2685_v34  ;;  %v2734_v7 = vld [vmem:[#allocation5 + $0x604] ss:$16 sps:$4 sm:$0xff]   ;;  %v2732_v11 = vld [vmem:[#allocation5 + $0x600] ss:$16 sps:$4 sm:$0xff]  }
  0x63   :  { %1366 = vmatpush2.bf16.msra.mxu1 %v2686_v35  ;;  %1326 = vmatprep.subr.bf16.mxu0 %v2687_v36  ;;  %v2737_v12 = vld [vmem:[#allocation5 + $0x4c4] ss:$16 sps:$4 sm:$0xff]   ;;  %v2735_v14 = vld [vmem:[#allocation5 + $0x4c0] ss:$16 sps:$4 sm:$0xff]  }
  0x64   :  { %1367 = vmatprep.subr.bf16.mxu1 %v2689_v37  ;;  %v2743_v17 = vld [vmem:[#allocation5 + $0x4a4] ss:$16 sps:$4 sm:$0xff]   ;;  %v2741_v20 = vld [vmem:[#allocation5 + $0x4a0] ss:$16 sps:$4 sm:$0xff]   ;;  %v2762_v37 = vld [vmem:[#allocation5 + $0x68] ss:$16 sps:$4 sm:$0xff]  }
  0x65   :  { %v2749_v22 = vld [vmem:[#allocation5 + $0x484] ss:$16 sps:$4 sm:$0xff]   ;;  %v2747_v24 = vld [vmem:[#allocation5 + $0x480] ss:$16 sps:$4 sm:$0xff]  }
  0x66   :  { %1327 = vmatpush2.bf16.msra.mxu0 %v2691_v38  ;;  %v2755_v26 = vld [vmem:[#allocation5 + $0x464] ss:$16 sps:$4 sm:$0xff]   ;;  %v2753_v28 = vld [vmem:[#allocation5 + $0x460] ss:$16 sps:$4 sm:$0xff]  }
  0x67   :  { %1368 = vmatpush2.bf16.msra.mxu1 %v2692_v39  ;;  %1328 = vmatprep.subr.bf16.mxu0 %v2693_v40  ;;  %v2761_v30 = vld [vmem:[#allocation5 + $0x444] ss:$16 sps:$4 sm:$0xff]   ;;  %v2759_v32 = vld [vmem:[#allocation5 + $0x440] ss:$16 sps:$4 sm:$0xff]   ;;  %v2770_v39 = vld [vmem:[#allocation5 + $0x4c] ss:$16 sps:$4 sm:$0xff]  }
  0x68   :  { %1369 = vmatprep.subr.bf16.mxu1 %v2695_v41  ;;  %v2767_v34 = vld [vmem:[#allocation5 + $0x424] ss:$16 sps:$4 sm:$0xff]   ;;  %v2765_v38 = vld [vmem:[#allocation5 + $0x420] ss:$16 sps:$4 sm:$0xff]   ;;  %v2768_v41 = vld [vmem:[#allocation5 + $0x48] ss:$16 sps:$4 sm:$0xff]  }
  0x69   :  { %v97_v35 = vld [vmem:[#allocation2 + $0x28] sm:$0xff] }
  0x6a   :  { %1329 = vmatpush2.bf16.msra.mxu0 %v2697_v42  ;;  %v3253_v36 = vpack.c.bf16 %v97_v35, %v97_v35  ;;  %v2773_v40 = vld [vmem:[#allocation5 + $0x404] ss:$16 sps:$4 sm:$0xff]   ;;  %v2771_v42 = vld [vmem:[#allocation5 + $0x400] ss:$16 sps:$4 sm:$0xff]   ;;  %v2851_v35 = vld [vmem:[#allocation5 + $0x26c] ss:$16 sps:$4 sm:$0xff]  }
  0x6b   :  { %1370 = vmatpush2.bf16.msra.mxu1 %v2698_v43  ;;  %1330 = vmatprep.subr.bf16.mxu0 %v2699_v44  ;;  %v2776_v43 = vld [vmem:[#allocation5 + $0x2c] ss:$16 sps:$4 sm:$0xff]   ;;  %v2779_v44 = vld [vmem:[#allocation5 + $0x5e4] ss:$16 sps:$4 sm:$0xff]   ;;  %v2777_v46 = vld [vmem:[#allocation5 + $0x5e0] ss:$16 sps:$4 sm:$0xff]  }
  0x6c   :  { %1371 = vmatprep.subr.bf16.mxu1 %v2701_v45  ;;  %v2774_v45 = vld [vmem:[#allocation5 + $0x28] ss:$16 sps:$4 sm:$0xff]   ;;  %v2783_v50 = vld [vmem:[#allocation5 + $0x5c0] ss:$16 sps:$4 sm:$0xff]   ;;  %v2815_v5 = vld [vmem:[#allocation5 + $0x524] ss:$16 sps:$4 sm:$0xff]  }
  0x6e   :  { %1331 = vmatpush2.bf16.msra.mxu0 %v2703_v47  ;;  %v2782_v47 = vld [vmem:[#allocation5 + $0xc] ss:$16 sps:$4 sm:$0xff]  }
  0x6f   :  { %1372 = vmatpush2.bf16.msra.mxu1 %v2704_v48  ;;  %1332 = vmatprep.subr.bf16.mxu0 %v2705_v51  ;;  %v2785_v48 = vld [vmem:[#allocation5 + $0x5c4] ss:$16 sps:$4 sm:$0xff]   ;;  %v2788_v51 = vld [vmem:[#allocation5 + $0x1ec] ss:$16 sps:$4 sm:$0xff]  }
  0x70   :  { %1373 = vmatprep.subr.bf16.mxu1 %v2707_v53  ;;  %v2791_v53 = vld [vmem:[#allocation5 + $0x5a4] ss:$16 sps:$4 sm:$0xff]  }
  0x72   :  { %1333 = vmatpush2.bf16.msra.mxu0 %v2709_v54  ;;  %v2786_v54 = vld [vmem:[#allocation5 + $0x1e8] ss:$16 sps:$4 sm:$0xff]  }
  0x73   :  { %1374 = vmatpush2.bf16.msra.mxu1 %v2710_v55  ;;  %1334 = vmatprep.subr.bf16.mxu0 %v2711_v56  ;;  %v2789_v55 = vld [vmem:[#allocation5 + $0x5a0] ss:$16 sps:$4 sm:$0xff]   ;;  %v2794_v56 = vld [vmem:[#allocation5 + $0x1cc] ss:$16 sps:$4 sm:$0xff]  }
  0x74   :  { %1375 = vmatprep.subr.bf16.mxu1 %v2713_v57  ;;  %v2797_v57 = vld [vmem:[#allocation5 + $0x584] ss:$16 sps:$4 sm:$0xff]  }
  0x76   :  { %1335 = vmatpush2.bf16.msra.mxu0 %v2715_v58  ;;  %v2792_v58 = vld [vmem:[#allocation5 + $0x1c8] ss:$16 sps:$4 sm:$0xff]  }
  0x77   :  { %1376 = vmatpush2.bf16.msra.mxu1 %v2716_v59  ;;  %1336 = vmatprep.subr.bf16.mxu0 %v2717_v60  ;;  %v2795_v59 = vld [vmem:[#allocation5 + $0x580] ss:$16 sps:$4 sm:$0xff]   ;;  %v2800_v60 = vld [vmem:[#allocation5 + $0x1ac] ss:$16 sps:$4 sm:$0xff]  }
  0x78   :  { %1377 = vmatprep.subr.bf16.mxu1 %v2719_v61  ;;  %v2803_v61 = vld [vmem:[#allocation5 + $0x564] ss:$16 sps:$4 sm:$0xff]  }
  0x7a   :  { %1337 = vmatpush2.bf16.msra.mxu0 %v2721_v62  ;;  %v2798_v62 = vld [vmem:[#allocation5 + $0x1a8] ss:$16 sps:$4 sm:$0xff]  }
  0x7b   :  { %1378 = vmatpush2.bf16.msra.mxu1 %v2722_v63  ;;  %1338 = vmatprep.subr.bf16.mxu0 %v2723_v0  ;;  %v2801_v63 = vld [vmem:[#allocation5 + $0x560] ss:$16 sps:$4 sm:$0xff]   ;;  %v2806_v0 = vld [vmem:[#allocation5 + $0x18c] ss:$16 sps:$4 sm:$0xff]  }
  0x7c   :  { %1379 = vmatprep.subr.bf16.mxu1 %v2725_v1  ;;  %v2809_v1 = vld [vmem:[#allocation5 + $0x544] ss:$16 sps:$4 sm:$0xff]  }
  0x7e   :  { %1339 = vmatpush2.bf16.msra.mxu0 %v2727_v2  ;;  %v2804_v2 = vld [vmem:[#allocation5 + $0x188] ss:$16 sps:$4 sm:$0xff]  }
  0x7f   :  { %1380 = vmatpush2.bf16.msra.mxu1 %v2728_v3  ;;  %1390 = vmatprep.subr.bf16.mxu0 %v2731_v6  ;;  %v2807_v3 = vld [vmem:[#allocation5 + $0x540] ss:$16 sps:$4 sm:$0xff]   ;;  %v2810_v6 = vld [vmem:[#allocation5 + $0x168] ss:$16 sps:$4 sm:$0xff]  }
  0x80   :  { %1445 = vmatprep.subr.bf16.mxu1 %v2734_v7  ;;  %v2813_v7 = vld [vmem:[#allocation5 + $0x520] ss:$16 sps:$4 sm:$0xff]  }
  0x81   :  { %1341 = vmatmul.mubr.bf16.vlgmr.msra.gmra.mxu0 %v3241_v8 }
  0x82   :  { %1382 = vmatmul.mubr.bf16.vlgmr.msra.gmra.mxu1 %v3243_v9  ;;  %1391 = vmatpush1.bf16.msra.mxu0 %v2729_v10  ;;  %v2818_v10 = vld [vmem:[#allocation5 + $0x14c] ss:$16 sps:$4 sm:$0xff]  }
  0x83   :  { %1446 = vmatpush1.bf16.msra.mxu1 %v2732_v11  ;;  %1392 = vmatprep.subr.bf16.mxu0 %v2737_v12  ;;  %v2821_v11 = vld [vmem:[#allocation5 + $0x504] ss:$16 sps:$4 sm:$0xff]   ;;  %v2816_v12 = vld [vmem:[#allocation5 + $0x148] ss:$16 sps:$4 sm:$0xff]  }
  0x84   :  { %1463 = vmatprep.mubr.bf16.mxu1 %v3178_v16  ;;  %1472 = vmatprep.subr.bf16.mxu1 %v2740_v13  ;;  %v2819_v13 = vld [vmem:[#allocation5 + $0x500] ss:$16 sps:$4 sm:$0xff]  }
  0x85   :  { %1422 = vmatprep.mubr.bf16.mxu0 %v3253_v36 }
  0x86   :  { %1393 = vmatpush1.bf16.msra.mxu0 %v2735_v14  ;;  %v2824_v14 = vld [vmem:[#allocation5 + $0x12c] ss:$16 sps:$4 sm:$0xff]  }
  0x87   :  { %1394 = vmatprep.subr.bf16.mxu0 %v2743_v17  ;;  %v2827_v17 = vld [vmem:[#allocation5 + $0x2ec] ss:$16 sps:$4 sm:$0xff]  }
  0x8a   :  { %2515 = vmatmul.mubr.msk.bf16.vlgmr.msra.gmra.mxu1 %vm1304_vm0, %v3248_v19  ;;  %1395 = vmatpush1.bf16.msra.mxu0 %v2741_v20  ;;  %v3256_v20 = vpack.c.bf16 %v96_v15, %v96_v15  ;;  %v2914_v15 = vld [vmem:[#allocation5 + $0x54c] ss:$16 sps:$4 sm:$0xff]  }
  0x8b   :  { %1473 = vmatpush1.bf16.msra.mxu1 %v2738_v18  ;;  %1396 = vmatprep.subr.bf16.mxu0 %v2749_v22  ;;  %v2822_v18 = vld [vmem:[#allocation5 + $0x128] ss:$16 sps:$4 sm:$0xff]   ;;  %v2830_v22 = vld [vmem:[#allocation5 + $0x10c] ss:$16 sps:$4 sm:$0xff]  }
  0x8c   :  { %1474 = vmatprep.subr.bf16.mxu1 %v2746_v21  ;;  %1504 = vmatprep.mubr.bf16.mxu1 %v3235_v49  ;;  %v2780_v49 = vld [vmem:[#allocation5 + $0x8] ss:$16 sps:$4 sm:$0xff]  }
  0x8d   :  { %v2825_v21 = vld [vmem:[#allocation5 + $0x2e8] ss:$16 sps:$4 sm:$0xff]  }
  0x8e   :  { %1397 = vmatpush1.bf16.msra.mxu0 %v2747_v24  ;;  %v2828_v24 = vld [vmem:[#allocation5 + $0x108] ss:$16 sps:$4 sm:$0xff]  }
  0x8f   :  { %1475 = vmatpush1.bf16.msra.mxu1 %v2744_v23  ;;  %1398 = vmatprep.subr.bf16.mxu0 %v2755_v26  ;;  %v2833_v23 = vld [vmem:[#allocation5 + $0x2cc] ss:$16 sps:$4 sm:$0xff]  }
  0x90   :  { %1476 = vmatprep.subr.bf16.mxu1 %v2752_v25  ;;  %v2831_v25 = vld [vmem:[#allocation5 + $0x2c8] ss:$16 sps:$4 sm:$0xff]   ;;  %v2836_v26 = vld [vmem:[#allocation5 + $0x4ec] ss:$16 sps:$4 sm:$0xff]  }
  0x92   :  { %1399 = vmatpush1.bf16.msra.mxu0 %v2753_v28  ;;  %v2834_v28 = vld [vmem:[#allocation5 + $0x4e8] ss:$16 sps:$4 sm:$0xff]  }
  0x93   :  { %1477 = vmatpush1.bf16.msra.mxu1 %v2750_v27  ;;  %1400 = vmatprep.subr.bf16.mxu0 %v2761_v30  ;;  %v2839_v27 = vld [vmem:[#allocation5 + $0x2ac] ss:$16 sps:$4 sm:$0xff]  }
  0x94   :  { %1478 = vmatprep.subr.bf16.mxu1 %v2758_v29  ;;  %v2837_v29 = vld [vmem:[#allocation5 + $0x2a8] ss:$16 sps:$4 sm:$0xff]   ;;  %v2842_v30 = vld [vmem:[#allocation5 + $0x4cc] ss:$16 sps:$4 sm:$0xff]  }
  0x96   :  { %1401 = vmatpush1.bf16.msra.mxu0 %v2759_v32  ;;  %v2840_v32 = vld [vmem:[#allocation5 + $0x4c8] ss:$16 sps:$4 sm:$0xff]  }
  0x97   :  { %1479 = vmatpush1.bf16.msra.mxu1 %v2756_v31  ;;  %1402 = vmatprep.subr.bf16.mxu0 %v2767_v34  ;;  %v2845_v31 = vld [vmem:[#allocation5 + $0x28c] ss:$16 sps:$4 sm:$0xff]  }
  0x98   :  { %1480 = vmatprep.subr.bf16.mxu1 %v2764_v33  ;;  %v2843_v33 = vld [vmem:[#allocation5 + $0x288] ss:$16 sps:$4 sm:$0xff]   ;;  %v2848_v34 = vld [vmem:[#allocation5 + $0x4ac] ss:$16 sps:$4 sm:$0xff]  }
  0x9a   :  { %1403 = vmatpush1.bf16.msra.mxu0 %v2765_v38  ;;  %v2854_v38 = vld [vmem:[#allocation5 + $0x48c] ss:$16 sps:$4 sm:$0xff]  }
  0x9b   :  { %1481 = vmatpush1.bf16.msra.mxu1 %v2762_v37  ;;  %1404 = vmatprep.subr.bf16.mxu0 %v2773_v40  ;;  %v2846_v37 = vld [vmem:[#allocation5 + $0x4a8] ss:$16 sps:$4 sm:$0xff]  }
  0x9c   :  { %1482 = vmatprep.subr.bf16.mxu1 %v2770_v39  ;;  %v2857_v39 = vld [vmem:[#allocation5 + $0x24c] ss:$16 sps:$4 sm:$0xff]   ;;  %v2852_v40 = vld [vmem:[#allocation5 + $0x488] ss:$16 sps:$4 sm:$0xff]  }
  0x9e   :  { %1405 = vmatpush1.bf16.msra.mxu0 %v2771_v42  ;;  %v2863_v42 = vld [vmem:[#allocation5 + $0x22c] ss:$16 sps:$4 sm:$0xff]  }
  0x9f   :  { %1483 = vmatpush1.bf16.msra.mxu1 %v2768_v41  ;;  %1406 = vmatprep.subr.bf16.mxu0 %v2779_v44  ;;  %v2860_v41 = vld [vmem:[#allocation5 + $0x46c] ss:$16 sps:$4 sm:$0xff]   ;;  %v2861_v44 = vld [vmem:[#allocation5 + $0x228] ss:$16 sps:$4 sm:$0xff]  }
  0xa0   :  { %1484 = vmatprep.subr.bf16.mxu1 %v2776_v43  ;;  %v2858_v43 = vld [vmem:[#allocation5 + $0x468] ss:$16 sps:$4 sm:$0xff]  }
  0xa2   :  { %1407 = vmatpush2.bf16.msra.mxu0 %v2777_v46  ;;  %v2864_v46 = vld [vmem:[#allocation5 + $0x448] ss:$16 sps:$4 sm:$0xff]  }
  0xa3   :  { %1485 = vmatpush1.bf16.msra.mxu1 %v2774_v45  ;;  %1408 = vmatprep.subr.bf16.mxu0 %v2785_v48  ;;  %v2869_v45 = vld [vmem:[#allocation5 + $0x20c] ss:$16 sps:$4 sm:$0xff]  }
  0xa4   :  { %1486 = vmatprep.subr.bf16.mxu1 %v2782_v47  ;;  %v2867_v47 = vld [vmem:[#allocation5 + $0x208] ss:$16 sps:$4 sm:$0xff]   ;;  %v2872_v48 = vld [vmem:[#allocation5 + $0x42c] ss:$16 sps:$4 sm:$0xff]  }
  0xa6   :  { %1409 = vmatpush2.bf16.msra.mxu0 %v2783_v50  ;;  %v2870_v50 = vld [vmem:[#allocation5 + $0x428] ss:$16 sps:$4 sm:$0xff]  }
  0xa7   :  { %1487 = vmatpush1.bf16.msra.mxu1 %v2780_v49  ;;  %1410 = vmatprep.subr.bf16.mxu0 %v2791_v53  ;;  %v2875_v49 = vld [vmem:[#allocation5 + $0x3ec] ss:$16 sps:$4 sm:$0xff]  }
  0xa8   :  { %1488 = vmatprep.subr.bf16.mxu1 %v2788_v51  ;;  %v2873_v51 = vld [vmem:[#allocation5 + $0x3e8] ss:$16 sps:$4 sm:$0xff]   ;;  %v2878_v53 = vld [vmem:[#allocation5 + $0x40c] ss:$16 sps:$4 sm:$0xff]  }
  0xaa   :  { %1411 = vmatpush2.bf16.msra.mxu0 %v2789_v55  ;;  %v2876_v55 = vld [vmem:[#allocation5 + $0x408] ss:$16 sps:$4 sm:$0xff]  }
  0xab   :  { %1489 = vmatpush2.bf16.msra.mxu1 %v2786_v54  ;;  %1412 = vmatprep.subr.bf16.mxu0 %v2797_v57  ;;  %v2881_v54 = vld [vmem:[#allocation5 + $0x3cc] ss:$16 sps:$4 sm:$0xff]  }
  0xac   :  { %1490 = vmatprep.subr.bf16.mxu1 %v2794_v56  ;;  %v2879_v56 = vld [vmem:[#allocation5 + $0x3c8] ss:$16 sps:$4 sm:$0xff]   ;;  %v2884_v57 = vld [vmem:[#allocation5 + $0x5ec] ss:$16 sps:$4 sm:$0xff]  }
  0xae   :  { %1413 = vmatpush2.bf16.msra.mxu0 %v2795_v59  ;;  %v2882_v59 = vld [vmem:[#allocation5 + $0x5e8] ss:$16 sps:$4 sm:$0xff]  }
  0xaf   :  { %1491 = vmatpush2.bf16.msra.mxu1 %v2792_v58  ;;  %1414 = vmatprep.subr.bf16.mxu0 %v2803_v61  ;;  %v2887_v58 = vld [vmem:[#allocation5 + $0x3ac] ss:$16 sps:$4 sm:$0xff]  }
  0xb0   :  { %1492 = vmatprep.subr.bf16.mxu1 %v2800_v60  ;;  %v2885_v60 = vld [vmem:[#allocation5 + $0x3a8] ss:$16 sps:$4 sm:$0xff]   ;;  %v2890_v61 = vld [vmem:[#allocation5 + $0x5cc] ss:$16 sps:$4 sm:$0xff]  }
  0xb2   :  { %1415 = vmatpush2.bf16.msra.mxu0 %v2801_v63  ;;  %v2888_v63 = vld [vmem:[#allocation5 + $0x5c8] ss:$16 sps:$4 sm:$0xff]  }
  0xb3   :  { %1493 = vmatpush2.bf16.msra.mxu1 %v2798_v62  ;;  %1416 = vmatprep.subr.bf16.mxu0 %v2809_v1  ;;  %v2893_v62 = vld [vmem:[#allocation5 + $0x38c] ss:$16 sps:$4 sm:$0xff]  }
  0xb4   :  { %1494 = vmatprep.subr.bf16.mxu1 %v2806_v0  ;;  %v2891_v0 = vld [vmem:[#allocation5 + $0x388] ss:$16 sps:$4 sm:$0xff]   ;;  %v2896_v1 = vld [vmem:[#allocation5 + $0x5ac] ss:$16 sps:$4 sm:$0xff]  }
  0xb6   :  { %1417 = vmatpush2.bf16.msra.mxu0 %v2807_v3  ;;  %v2894_v3 = vld [vmem:[#allocation5 + $0x5a8] ss:$16 sps:$4 sm:$0xff]  }
  0xb7   :  { %1495 = vmatpush2.bf16.msra.mxu1 %v2804_v2  ;;  %1418 = vmatprep.subr.bf16.mxu0 %v2815_v5  ;;  %v2899_v2 = vld [vmem:[#allocation5 + $0x36c] ss:$16 sps:$4 sm:$0xff]  }
  0xb8   :  { %1496 = vmatprep.subr.bf16.mxu1 %v2812_v4  ;;  %v2897_v4 = vld [vmem:[#allocation5 + $0x368] ss:$16 sps:$4 sm:$0xff]   ;;  %v2902_v5 = vld [vmem:[#allocation5 + $0x58c] ss:$16 sps:$4 sm:$0xff]  }
  0xba   :  { %1419 = vmatpush2.bf16.msra.mxu0 %v2813_v7  ;;  %v2900_v7 = vld [vmem:[#allocation5 + $0x588] ss:$16 sps:$4 sm:$0xff]  }
  0xbb   :  { %1497 = vmatpush2.bf16.msra.mxu1 %v2810_v6  ;;  %1420 = vmatprep.subr.bf16.mxu0 %v2821_v11  ;;  %v2905_v6 = vld [vmem:[#allocation5 + $0x34c] ss:$16 sps:$4 sm:$0xff]  }
  0xbc   :  { %1498 = vmatprep.subr.bf16.mxu1 %v2818_v10  ;;  %v2903_v10 = vld [vmem:[#allocation5 + $0x348] ss:$16 sps:$4 sm:$0xff]   ;;  %v2908_v11 = vld [vmem:[#allocation5 + $0x56c] ss:$16 sps:$4 sm:$0xff]  }
  0xbe   :  { %1421 = vmatpush2.bf16.msra.mxu0 %v2819_v13  ;;  %v2906_v13 = vld [vmem:[#allocation5 + $0x568] ss:$16 sps:$4 sm:$0xff]  }
  0xbf   :  { %1499 = vmatpush2.bf16.msra.mxu1 %v2816_v12  ;;  %1513 = vmatprep.subr.bf16.mxu0 %v2827_v17  ;;  %v2911_v12 = vld [vmem:[#allocation5 + $0x32c] ss:$16 sps:$4 sm:$0xff]  }
  0xc0   :  { %1500 = vmatprep.subr.bf16.mxu1 %v2824_v14  ;;  %v2909_v14 = vld [vmem:[#allocation5 + $0x328] ss:$16 sps:$4 sm:$0xff]   ;;  %v2917_v17 = vld [vmem:[#allocation5 + $0x30c] ss:$16 sps:$4 sm:$0xff]  }
  0xc1   :  { %1423 = vmatmul.mubr.bf16.vlgmr.msra.gmra.mxu0 %v3256_v20 }
  0xc2   :  { %1514 = vmatpush1.bf16.msra.mxu0 %v2825_v21  ;;  %1545 = vmatprep.mubr.bf16.mxu0 %v3237_v52  ;;  %v2849_v52 = vld [vmem:[#allocation5 + $0x268] ss:$16 sps:$4 sm:$0xff]  }
  0xc3   :  { %1501 = vmatpush2.bf16.msra.mxu1 %v2822_v18  ;;  %1515 = vmatprep.subr.bf16.mxu0 %v2833_v23  ;;  %v2912_v18 = vld [vmem:[#allocation5 + $0x548] ss:$16 sps:$4 sm:$0xff]  }
  0xc4   :  { %1502 = vmatprep.subr.bf16.mxu1 %v2830_v22  ;;  %v2915_v21 = vld [vmem:[#allocation5 + $0x308] ss:$16 sps:$4 sm:$0xff]   ;;  %v2920_v22 = vld [vmem:[#allocation5 + $0x52c] ss:$16 sps:$4 sm:$0xff]  }
  0xc5   :  { %v2929_v23 = vld [vmem:[#allocation8 + $0x74] ss:$8 sps:$4 sm:$0xff]  }
  0xc6   :  { %1516 = vmatpush1.bf16.msra.mxu0 %v2831_v25  ;;  %v2927_v25 = vld [vmem:[#allocation8 + $0x70] ss:$8 sps:$4 sm:$0xff]  }
  0xc7   :  { %1503 = vmatpush2.bf16.msra.mxu1 %v2828_v24  ;;  %1517 = vmatprep.subr.bf16.mxu0 %v2839_v27  ;;  %v2918_v24 = vld [vmem:[#allocation5 + $0x528] ss:$16 sps:$4 sm:$0xff]  }
  0xc8   :  { %1554 = vmatprep.subr.bf16.mxu1 %v2836_v26  ;;  %v2923_v26 = vld [vmem:[#allocation5 + $0x50c] ss:$16 sps:$4 sm:$0xff]   ;;  %v2932_v27 = vld [vmem:[#allocation8 + $0x64] ss:$8 sps:$4 sm:$0xff]  }
  0xca   :  { %1505 = vmatmul.mubr.bf16.vlgmr.msra.gmra.mxu1 %v3241_v8  ;;  %1518 = vmatpush1.bf16.msra.mxu0 %v2837_v29  ;;  %v2855_v8 = vld [vmem:[#allocation5 + $0x248] ss:$16 sps:$4 sm:$0xff]   ;;  %v2930_v29 = vld [vmem:[#allocation8 + $0x60] ss:$8 sps:$4 sm:$0xff]  }
  0xcb   :  { %1555 = vmatpush1.bf16.msra.mxu1 %v2834_v28  ;;  %1519 = vmatprep.subr.bf16.mxu0 %v2845_v31  ;;  %v2921_v28 = vld [vmem:[#allocation5 + $0x508] ss:$16 sps:$4 sm:$0xff]  }
  0xcc   :  { %1556 = vmatprep.subr.bf16.mxu1 %v2842_v30  ;;  %1586 = vmatprep.mubr.bf16.mxu1 %v3253_v36  ;;  %v2866_v36 = vld [vmem:[#allocation5 + $0x44c] ss:$16 sps:$4 sm:$0xff]   ;;  %v2935_v31 = vld [vmem:[#allocation8 + $0x54] ss:$8 sps:$4 sm:$0xff]  }
  0xcd   :  { %v2926_v30 = vld [vmem:[#allocation5 + $0x60c] ss:$16 sps:$4 sm:$0xff]  }
  0xce   :  { %1520 = vmatpush1.bf16.msra.mxu0 %v2843_v33  ;;  %v2933_v33 = vld [vmem:[#allocation8 + $0x50] ss:$8 sps:$4 sm:$0xff]  }
  0xcf   :  { %1557 = vmatpush1.bf16.msra.mxu1 %v2840_v32  ;;  %1521 = vmatprep.subr.bf16.mxu0 %v2851_v35  ;;  %v2924_v32 = vld [vmem:[#allocation5 + $0x608] ss:$16 sps:$4 sm:$0xff]  }
  0xd0   :  { %1558 = vmatprep.subr.bf16.mxu1 %v2848_v34  ;;  %v2938_v34 = vld [vmem:[#allocation8 + $0x44] ss:$8 sps:$4 sm:$0xff]   ;;  %v2941_v35 = vld [vmem:[#allocation8 + $0x34] ss:$8 sps:$4 sm:$0xff]  }
  0xd2   :  { %1522 = vmatpush1.bf16.msra.mxu0 %v2849_v52  ;;  %v2975_v52 = vld [vmem:[#allocation8 + $0x170] ss:$8 sps:$4 sm:$0xff]  }
  0xd3   :  { %1559 = vmatpush1.bf16.msra.mxu1 %v2846_v37  ;;  %1523 = vmatprep.subr.bf16.mxu0 %v2857_v39  ;;  %v2939_v37 = vld [vmem:[#allocation8 + $0x30] ss:$8 sps:$4 sm:$0xff]   ;;  %v2944_v39 = vld [vmem:[#allocation8 + $0x24] ss:$8 sps:$4 sm:$0xff]  }
  0xd4   :  { %1560 = vmatprep.subr.bf16.mxu1 %v2854_v38  ;;  %v2977_v38 = vld [vmem:[#allocation8 + $0x174] ss:$8 sps:$4 sm:$0xff]  }
  0xd6   :  { %1524 = vmatpush1.bf16.msra.mxu0 %v2855_v8  ;;  %v2942_v8 = vld [vmem:[#allocation8 + $0x20] ss:$8 sps:$4 sm:$0xff]  }
  0xd7   :  { %1561 = vmatpush1.bf16.msra.mxu1 %v2852_v40  ;;  %1525 = vmatprep.subr.bf16.mxu0 %v2863_v42  ;;  %v2980_v40 = vld [vmem:[#allocation8 + $0x164] ss:$8 sps:$4 sm:$0xff]   ;;  %v2981_v42 = vld [vmem:[#allocation8 + $0x150] ss:$8 sps:$4 sm:$0xff]  }
  0xd8   :  { %1562 = vmatprep.subr.bf16.mxu1 %v2860_v41  ;;  %v2947_v41 = vld [vmem:[#allocation8 + $0x14] ss:$8 sps:$4 sm:$0xff]  }
  0xda   :  { %1526 = vmatpush1.bf16.msra.mxu0 %v2861_v44  ;;  %v2986_v44 = vld [vmem:[#allocation8 + $0x144] ss:$8 sps:$4 sm:$0xff]  }
  0xdb   :  { %1563 = vmatpush1.bf16.msra.mxu1 %v2858_v43  ;;  %1527 = vmatprep.subr.bf16.mxu0 %v2869_v45  ;;  %v2945_v43 = vld [vmem:[#allocation8 + $0x10] ss:$8 sps:$4 sm:$0xff]   ;;  %v2984_v45 = vld [vmem:[#allocation8 + $0x140] ss:$8 sps:$4 sm:$0xff]  }
  0xdc   :  { %1564 = vmatprep.subr.bf16.mxu1 %v2866_v36  ;;  %v2950_v36 = vld [vmem:[#allocation8 + $0x4] ss:$8 sps:$4 sm:$0xff]  }
  0xde   :  { %1528 = vmatpush1.bf16.msra.mxu0 %v2867_v47  ;;  %v2953_v47 = vld [vmem:[#allocation8 + $0xf4] ss:$8 sps:$4 sm:$0xff]  }
  0xdf   :  { %1565 = vmatpush1.bf16.msra.mxu1 %v2864_v46  ;;  %1529 = vmatprep.subr.bf16.mxu0 %v2875_v49  ;;  %v2989_v46 = vld [vmem:[#allocation8 + $0x134] ss:$8 sps:$4 sm:$0xff]   ;;  %v2951_v49 = vld [vmem:[#allocation8 + $0xf0] ss:$8 sps:$4 sm:$0xff]  }
  0xe0   :  { %1566 = vmatprep.subr.bf16.mxu1 %v2872_v48  ;;  %v2987_v48 = vld [vmem:[#allocation8 + $0x130] ss:$8 sps:$4 sm:$0xff]  }
  0xe2   :  { %1530 = vmatpush2.bf16.msra.mxu0 %v2873_v51  ;;  %v2956_v51 = vld [vmem:[#allocation8 + $0xe4] ss:$8 sps:$4 sm:$0xff]  }
  0xe3   :  { %1567 = vmatpush1.bf16.msra.mxu1 %v2870_v50  ;;  %1531 = vmatprep.subr.bf16.mxu0 %v2881_v54  ;;  %v2992_v50 = vld [vmem:[#allocation8 + $0x124] ss:$8 sps:$4 sm:$0xff]   ;;  %v2954_v54 = vld [vmem:[#allocation8 + $0xe0] ss:$8 sps:$4 sm:$0xff]  }
  0xe4   :  { %1568 = vmatprep.subr.bf16.mxu1 %v2878_v53  ;;  %v2990_v53 = vld [vmem:[#allocation8 + $0x120] ss:$8 sps:$4 sm:$0xff]  }
  0xe6   :  { %1532 = vmatpush2.bf16.msra.mxu0 %v2879_v56  ;;  %v2959_v56 = vld [vmem:[#allocation8 + $0xd4] ss:$8 sps:$4 sm:$0xff]  }
  0xe7   :  { %1569 = vmatpush1.bf16.msra.mxu1 %v2876_v55  ;;  %1533 = vmatprep.subr.bf16.mxu0 %v2887_v58  ;;  %v2995_v55 = vld [vmem:[#allocation8 + $0x114] ss:$8 sps:$4 sm:$0xff]   ;;  %v2957_v58 = vld [vmem:[#allocation8 + $0xd0] ss:$8 sps:$4 sm:$0xff]  }
  0xe8   :  { %1570 = vmatprep.subr.bf16.mxu1 %v2884_v57  ;;  %v2993_v57 = vld [vmem:[#allocation8 + $0x110] ss:$8 sps:$4 sm:$0xff]  }
  0xea   :  { %1534 = vmatpush2.bf16.msra.mxu0 %v2885_v60  ;;  %v2962_v60 = vld [vmem:[#allocation8 + $0xc4] ss:$8 sps:$4 sm:$0xff]  }
  0xeb   :  { %1571 = vmatpush2.bf16.msra.mxu1 %v2882_v59  ;;  %1535 = vmatprep.subr.bf16.mxu0 %v2893_v62  ;;  %v2998_v59 = vld [vmem:[#allocation8 + $0x104] ss:$8 sps:$4 sm:$0xff]   ;;  %v2960_v62 = vld [vmem:[#allocation8 + $0xc0] ss:$8 sps:$4 sm:$0xff]  }
  0xec   :  { %1572 = vmatprep.subr.bf16.mxu1 %v2890_v61  ;;  %v2996_v61 = vld [vmem:[#allocation8 + $0x100] ss:$8 sps:$4 sm:$0xff]  }
  0xee   :  { %1536 = vmatpush2.bf16.msra.mxu0 %v2891_v0  ;;  %v2965_v0 = vld [vmem:[#allocation8 + $0xb4] ss:$8 sps:$4 sm:$0xff]  }
  0xef   :  { %1573 = vmatpush2.bf16.msra.mxu1 %v2888_v63  ;;  %1537 = vmatprep.subr.bf16.mxu0 %v2899_v2  ;;  %v3001_v63 = vld [vmem:[#allocation8 + $0x1f4] ss:$8 sps:$4 sm:$0xff]   ;;  %v2963_v2 = vld [vmem:[#allocation8 + $0xb0] ss:$8 sps:$4 sm:$0xff]  }
  0xf0   :  { %1574 = vmatprep.subr.bf16.mxu1 %v2896_v1  ;;  %v2999_v1 = vld [vmem:[#allocation8 + $0x1f0] ss:$8 sps:$4 sm:$0xff]  }
  0xf2   :  { %1538 = vmatpush2.bf16.msra.mxu0 %v2897_v4  ;;  %v2968_v4 = vld [vmem:[#allocation8 + $0xa4] ss:$8 sps:$4 sm:$0xff]  }
  0xf3   :  { %1575 = vmatpush2.bf16.msra.mxu1 %v2894_v3  ;;  %1539 = vmatprep.subr.bf16.mxu0 %v2905_v6  ;;  %v3004_v3 = vld [vmem:[#allocation8 + $0x1e4] ss:$8 sps:$4 sm:$0xff]   ;;  %v2966_v6 = vld [vmem:[#allocation8 + $0xa0] ss:$8 sps:$4 sm:$0xff]  }
  0xf4   :  { %1576 = vmatprep.subr.bf16.mxu1 %v2902_v5  ;;  %v3002_v5 = vld [vmem:[#allocation8 + $0x1e0] ss:$8 sps:$4 sm:$0xff]  }
  0xf6   :  { %1540 = vmatpush2.bf16.msra.mxu0 %v2903_v10  ;;  %v2969_v10 = vld [vmem:[#allocation8 + $0x90] ss:$8 sps:$4 sm:$0xff]  }
  0xf7   :  { %1577 = vmatpush2.bf16.msra.mxu1 %v2900_v7  ;;  %1541 = vmatprep.subr.bf16.mxu0 %v2911_v12  ;;  %v2971_v7 = vld [vmem:[#allocation8 + $0x94] ss:$8 sps:$4 sm:$0xff]   ;;  %v2972_v12 = vld [vmem:[#allocation8 + $0x80] ss:$8 sps:$4 sm:$0xff]  }
  0xf8   :  { %1578 = vmatprep.subr.bf16.mxu1 %v2908_v11  ;;  %v2974_v11 = vld [vmem:[#allocation8 + $0x84] ss:$8 sps:$4 sm:$0xff]  }
  0xfa   :  { %1542 = vmatpush2.bf16.msra.mxu0 %v2909_v14 }
  0xfb   :  { %1579 = vmatpush2.bf16.msra.mxu1 %v2906_v13  ;;  %1543 = vmatprep.subr.bf16.mxu0 %v2917_v17  ;;  %v3005_v17 = vld [vmem:[#allocation8 + $0x1d0] ss:$8 sps:$4 sm:$0xff]  }
  0xfc   :  { %1580 = vmatprep.subr.bf16.mxu1 %v2914_v15  ;;  %v3007_v15 = vld [vmem:[#allocation8 + $0x1d4] ss:$8 sps:$4 sm:$0xff]  }
  0xfe   :  { %1544 = vmatpush2.bf16.msra.mxu0 %v2915_v21 }
  0xff   :  { %1581 = vmatpush2.bf16.msra.mxu1 %v2912_v18  ;;  %2040 = vmatprep.subr.bf16.mxu0 %v2929_v23  ;;  %v3010_v23 = vld [vmem:[#allocation8 + $0x1c4] ss:$8 sps:$4 sm:$0xff]  }
 0x100   :  { %1582 = vmatprep.subr.bf16.mxu1 %v2920_v22  ;;  %v3008_v22 = vld [vmem:[#allocation8 + $0x1c0] ss:$8 sps:$4 sm:$0xff]  }
 0x101   :  { %1546 = vmatmul.mubr.bf16.vlgmr.msra.gmra.mxu0 %v3243_v9  ;;  %v2936_v9 = vld [vmem:[#allocation8 + $0x40] ss:$8 sps:$4 sm:$0xff]  }
 0x102   :  { %2041 = vmatpush1.bf16.msra.mxu0 %v2927_v25 }
 0x103   :  { %1583 = vmatpush2.bf16.msra.mxu1 %v2918_v24  ;;  %2042 = vmatprep.subr.bf16.mxu0 %v2932_v27 }
 0x104   :  { %1584 = vmatprep.subr.bf16.mxu1 %v2923_v26 }
 0x106   :  { %2043 = vmatpush1.bf16.msra.mxu0 %v2930_v29  ;;  %v3013_v29 = vld [vmem:[#allocation8 + $0x1b4] ss:$8 sps:$4 sm:$0xff]  }
 0x107   :  { %1585 = vmatpush2.bf16.msra.mxu1 %v2921_v28  ;;  %2044 = vmatprep.subr.bf16.mxu0 %v2935_v31 }
 0x108   :  { %1609 = vmatprep.subr.bf16.mxu1 %v2926_v30  ;;  %v3011_v30 = vld [vmem:[#allocation8 + $0x1b0] ss:$8 sps:$4 sm:$0xff]  }
 0x10a   :  { %1587 = vmatmul.mubr.bf16.vlgmr.msra.gmra.mxu1 %v3256_v20  ;;  %2045 = vmatpush1.bf16.msra.mxu0 %v2933_v33  ;;  %v2978_v20 = vld [vmem:[#allocation8 + $0x160] ss:$8 sps:$4 sm:$0xff]   ;;  %v3016_v33 = vld [vmem:[#allocation8 + $0x1a4] ss:$8 sps:$4 sm:$0xff]  }
 0x10b   :  { %1610 = vmatpush1.bf16.msra.mxu1 %v2924_v32  ;;  %1627 = vmatprep.mubr.bf16.mxu1 %v3178_v16  ;;  %v2983_v16 = vld [vmem:[#allocation8 + $0x154] ss:$8 sps:$4 sm:$0xff]  }
 0x10c   :  { %2046 = vmatprep.subr.bf16.mxu0 %v2938_v34  ;;  %2081 = vmatprep.subr.bf16.mxu1 %v2977_v38  ;;  %v3014_v34 = vld [vmem:[#allocation8 + $0x1a0] ss:$8 sps:$4 sm:$0xff]  }
 0x10d   :  { %v3020_v38 = vld [vmem:[#allocation8 + $0x180] ss:$8 sps:$4 sm:$0xff]  }
 0x10e   :  { %2047 = vmatpush1.bf16.msra.mxu0 %v2936_v9 }
 0x10f   :  { %2048 = vmatprep.subr.bf16.mxu0 %v2941_v35  ;;  %v3019_v35 = vld [vmem:[#allocation8 + $0x194] ss:$8 sps:$4 sm:$0xff]  }
 0x112   :  { %2516 = vmatmul.mubr.msk.bf16.vlgmr.msra.gmra.mxu1 %vm1304_vm0, %v3248_v19  ;;  %2049 = vmatpush1.bf16.msra.mxu0 %v2939_v37  ;;  %v2948_v19 = vld [vmem:[#allocation8] ss:$8 sps:$4 sm:$0xff]   ;;  %v3017_v37 = vld [vmem:[#allocation8 + $0x190] ss:$8 sps:$4 sm:$0xff]  }
 0x113   :  { %2082 = vmatpush1.bf16.msra.mxu1 %v2975_v52  ;;  %2050 = vmatprep.subr.bf16.mxu0 %v2944_v39  ;;  %v3022_v52 = vld [vmem:[#allocation8 + $0x184] ss:$8 sps:$4 sm:$0xff]   ;;  %v304_v39 = vlaneseq }
 0x114   :  { %2083 = vmatprep.subr.bf16.mxu1 %v2980_v40 }
 0x115   :  { %v3267_v40 = vshrl.u32 %v304_v39, 7  ;;  %v3032_v39 = vld [vmem:[#allocation10 + $0x18] sm:$0xff]  }
 0x116   :  { %2051 = vmatpush1.bf16.msra.mxu0 %v2942_v8  ;;  %v302_v8 = vld [vmem:[#allocation7] sm:$0xf] }
 0x117   :  { %2084 = vmatpush1.bf16.msra.mxu1 %v2978_v20  ;;  %2052 = vmatprep.subr.bf16.mxu0 %v2947_v41  ;;  %v306_v20 = vsub.s32 0, %v3267_v40 }
 0x118   :  { %2085 = vmatprep.subr.bf16.mxu1 %v2983_v16  ;;  %v310_v16 = vsub.s32 1, %v3267_v40 }
 0x119   :  { %v307_v41 = vrot.slane %v302_v8, %v306_v20 }
 0x11a   :  { %2053 = vmatpush1.bf16.msra.mxu0 %v2945_v43 }
 0x11b   :  { %2086 = vmatpush1.bf16.msra.mxu1 %v2981_v42  ;;  %2054 = vmatprep.subr.bf16.mxu0 %v2950_v36  ;;  %v311_v42 = vrot.slane %v302_v8, %v310_v16 }
 0x11c   :  { %2087 = vmatprep.subr.bf16.mxu1 %v2986_v44 }
 0x11e   :  { %2055 = vmatpush1.bf16.msra.mxu0 %v2948_v19 }
 0x11f   :  { %2088 = vmatpush1.bf16.msra.mxu1 %v2984_v45  ;;  %2056 = vmatprep.subr.bf16.mxu0 %v2953_v47 }
 0x120   :  { %2089 = vmatprep.subr.bf16.mxu1 %v2989_v46 }
 0x122   :  { %2057 = vmatpush2.bf16.msra.mxu0 %v2951_v49 }
 0x123   :  { %2090 = vmatpush1.bf16.msra.mxu1 %v2987_v48  ;;  %2058 = vmatprep.subr.bf16.mxu0 %v2956_v51 }
 0x124   :  { %2091 = vmatprep.subr.bf16.mxu1 %v2992_v50 }
 0x126   :  { %2059 = vmatpush2.bf16.msra.mxu0 %v2954_v54 }
 0x127   :  { %2092 = vmatpush1.bf16.msra.mxu1 %v2990_v53  ;;  %2060 = vmatprep.subr.bf16.mxu0 %v2959_v56 }
 0x128   :  { %2093 = vmatprep.subr.bf16.mxu1 %v2995_v55 }
 0x12a   :  { %2061 = vmatpush2.bf16.msra.mxu0 %v2957_v58 }
 0x12b   :  { %2094 = vmatpush1.bf16.msra.mxu1 %v2993_v57  ;;  %2062 = vmatprep.subr.bf16.mxu0 %v2962_v60 }
 0x12c   :  { %2095 = vmatprep.subr.bf16.mxu1 %v2998_v59 }
 0x12e   :  { %2063 = vmatpush2.bf16.msra.mxu0 %v2960_v62 }
 0x12f   :  { %2096 = vmatpush1.bf16.msra.mxu1 %v2996_v61  ;;  %2064 = vmatprep.subr.bf16.mxu0 %v2965_v0  ;;  %v314_v0 = vsub.s32 2, %v3267_v40 }
 0x130   :  { %2097 = vmatprep.subr.bf16.mxu1 %v3001_v63 }
 0x132   :  { %2065 = vmatpush2.bf16.msra.mxu0 %v2963_v2  ;;  %v318_v2 = vsub.s32 3, %v3267_v40  ;;  %v2581_v40 = vld [vmem:[%s3296_s6] ss:$0 sm:$0xff] }
 0x133   :  { %2098 = vmatpush2.bf16.msra.mxu1 %v2999_v1  ;;  %2066 = vmatprep.subr.bf16.mxu0 %v2968_v4  ;;  %v315_v4 = vrot.slane %v302_v8, %v314_v0 }
 0x134   :  { %2099 = vmatprep.subr.bf16.mxu1 %v3004_v3 }
 0x136   :  { %2067 = vmatpush2.bf16.msra.mxu0 %v2966_v6  ;;  %v319_v6 = vrot.slane %v302_v8, %v318_v2  ;;  %v3033_v8 = vld [vmem:[#allocation10 + $0x50] sm:$0xff]  }
 0x137   :  { %2100 = vmatpush2.bf16.msra.mxu1 %v3002_v5  ;;  %2068 = vmatprep.subr.bf16.mxu0 %v2971_v7 }
 0x138   :  { %2101 = vmatprep.subr.bf16.mxu1 %v3007_v15 }
 0x13a   :  { %2069 = vmatpush2.bf16.msra.mxu0 %v2969_v10 }
 0x13b   :  { %2070 = vmatprep.subr.bf16.mxu0 %v2974_v11  ;;  %2102 = vmatpush2.bf16.msra.mxu1 %v3005_v17 }
 0x13c   :  { %2103 = vmatprep.subr.bf16.mxu1 %v3010_v23 }
 0x13e   :  { %2071 = vmatpush2.bf16.msra.mxu0 %v2972_v12 }
 0x13f   :  { %2104 = vmatpush2.bf16.msra.mxu1 %v3008_v22 }
 0x140   :  { %2105 = vmatprep.subr.bf16.mxu1 %v3013_v29 }
 0x141   :  { %v1342_v13 = vpop.f32.mrf.mxu0 }
 0x142   :  { %v1383_v14 = vpop.f32.mrf.mxu1  ;;  %v1343_v43 = vadd.f32 %v1342_v13, %v307_v41  ;;  %v3034_v41 = vld [vmem:[#allocation10 + $0x10] sm:$0xff]  }
 0x143   :  { %v1344_v18 = vpop.f32.mrf.mxu0  ;;  %2106 = vmatpush2.bf16.msra.mxu1 %v3011_v30 }
 0x144   :  { %v1385_v21 = vpop.f32.mrf.mxu1  ;;  %2107 = vmatprep.subr.bf16.mxu1 %v3016_v33  ;;  %v1345_v44 = vadd.f32 %v1344_v18, %v311_v42  ;;  %v1384_v36 = vadd.f32 %v1383_v14, %v1343_v43  ;;  %v3027_v33 = vld [vmem:[#allocation10 + $0x68] sm:$0xff]  }
 0x145   :  { %v1346_v25 = vpop.f32.mrf.mxu0  ;;  %v3035_v42 = vld [vmem:[#allocation10 + $0x48] sm:$0xff]  }
 0x146   :  { %v1387_v24 = vpop.f32.mrf.mxu1  ;;  %v1386_v19 = vadd.f32 %v1385_v21, %v1345_v44  ;;  %v3024_v25 = vld [vmem:[#allocation10 + $0x38] sm:$0xff]   ;;  %v3036_v43 = vld [vmem:[#allocation10 + $0x8] sm:$0xff]   ;;  %v3037_v44 = vld [vmem:[#allocation10 + $0x40] sm:$0xff]  }
 0x147   :  { %v1347_v27 = vpop.f32.mrf.mxu0  ;;  %2108 = vmatpush2.bf16.msra.mxu1 %v3014_v34  ;;  %v3023_v24 = vld [vmem:[#allocation10 + $0x78] sm:$0xff]  }
 0x148   :  { %v1388_v26 = vpop.f32.mrf.mxu1  ;;  %2109 = vmatprep.subr.bf16.mxu1 %v3019_v35  ;;  %2598 = vmatprep.subr.bf16.mxu0 %v3023_v24  ;;  %v3028_v35 = vld [vmem:[#allocation10 + $0x28] sm:$0xff]  }
 0x149   :  { %v3025_v26 = vld [vmem:[#allocation10 + $0x70] sm:$0xff]  }
 0x14a   :  { %v1465_v28 = vpop.f32.mrf.mxu1 }
 0x14b   :  { %2110 = vmatpush2.bf16.msra.mxu1 %v3017_v37  ;;  %v3029_v37 = vld [vmem:[#allocation10 + $0x60] sm:$0xff]  }
 0x14c   :  { %v1467_v31 = vpop.f32.mrf.mxu1  ;;  %2111 = vmatprep.subr.bf16.mxu1 %v3022_v52  ;;  %v3030_v52 = vld [vmem:[#allocation10 + $0x20] sm:$0xff]  }
 0x14e   :  { %v1469_v32 = vpop.f32.mrf.mxu1 }
 0x14f   :  { %2112 = vmatpush2.bf16.msra.mxu1 %v3020_v38  ;;  %v3031_v38 = vld [vmem:[#allocation10 + $0x58] sm:$0xff]  }
 0x150   :  { %v1470_v9 = vpop.f32.mrf.mxu1 }
 0x181   :  { %v1424_v45 = vpop.f32.mrf.mxu0 }
 0x182   :  { %v1425_v46 = vadd.f32 %v1424_v45, %v1384_v36  ;;  %v3038_v36 = vld [vmem:[#allocation10] sm:$0xff]  }
 0x183   :  { %v1426_v47 = vpop.f32.mrf.mxu0 }
 0x184   :  { %v1466_v48 = vadd.f32 %v1465_v28, %v1425_v46  ;;  %v1427_v49 = vadd.f32 %v1426_v47, %v1386_v19 }
 0x185   :  { %v1428_v50 = vpop.f32.mrf.mxu0 }
 0x186   :  { %v1468_v51 = vadd.f32 %v1467_v31, %v1427_v49  ;;  %v1636_v53 = vmax.f32 %v1466_v48, 0.0  ;;  %v3026_v31 = vld [vmem:[#allocation10 + $0x30] sm:$0xff]   ;;  %v1708_v48 = vld [vmem:[%s3294_s4] sm:$0x3] }
 0x187   :  { %v1429_v54 = vpop.f32.mrf.mxu0  ;;  %v1713_v49 = vrot.slane %v1708_v48, %v306_v20  ;;  %v1717_v50 = vrot.slane %v1708_v48, %v310_v16 }
 0x188   :  { %v1637_v55 = vmax.f32 %v1468_v51, 0.0  ;;  %v1640_v58 = vpack.c.bf16 %v1636_v53, %v1636_v53 }
 0x18a   :  { %v1506_v56 = vpop.f32.mrf.mxu1  ;;  %v1641_v57 = vpack.c.bf16 %v1637_v55, %v1637_v55 }
 0x18b   :  { %v1507_v10 = vadd.f32 %v1506_v56, %v315_v4 }
 0x18c   :  { %v1508_v59 = vpop.f32.mrf.mxu1  ;;  %2072 = vmatprep.mubr.bf16.mxu0 %v1641_v57 }
 0x18d   :  { %2073 = vmatmul.mubr.bf16.vlgmr.msra.gmra.mxu0 %v1640_v58  ;;  %v1509_v12 = vadd.f32 %v1508_v59, %v319_v6 }
 0x18e   :  { %v1510_v60 = vpop.f32.mrf.mxu1  ;;  %2599 = vmatpush3.bf16.msra.mxu0 %v3024_v25 }
 0x18f   :  { %2600 = vmatprep.subr.bf16.mxu0 %v3025_v26 }
 0x190   :  { %v1511_v61 = vpop.f32.mrf.mxu1 }
 0x192   :  { %2601 = vmatpush3.bf16.msra.mxu0 %v3026_v31 }
 0x193   :  { %2602 = vmatprep.subr.bf16.mxu0 %v3027_v33 }
 0x196   :  { %2603 = vmatpush3.bf16.msra.mxu0 %v3028_v35 }
 0x197   :  { %2604 = vmatprep.subr.bf16.mxu0 %v3029_v37 }
 0x19a   :  { %2605 = vmatpush3.bf16.msra.mxu0 %v3030_v52 }
 0x19b   :  { %2606 = vmatprep.subr.bf16.mxu0 %v3031_v38 }
 0x19e   :  { %2607 = vmatpush3.bf16.msra.mxu0 %v3032_v39 }
 0x19f   :  { %2608 = vmatprep.subr.bf16.mxu0 %v3033_v8 }
 0x1a2   :  { %2609 = vmatpush3.bf16.msra.mxu0 %v3034_v41 }
 0x1a3   :  { %2610 = vmatprep.subr.bf16.mxu0 %v3035_v42 }
 0x1a6   :  { %2611 = vmatpush3.bf16.msra.mxu0 %v3036_v43 }
 0x1a7   :  { %2612 = vmatprep.subr.bf16.mxu0 %v3037_v44 }
 0x1aa   :  { %2613 = vmatpush3.bf16.msra.mxu0 %v3038_v36 }
 0x1c1   :  { %v1547_v62 = vpop.f32.mrf.mxu0 }
 0x1c2   :  { %v1548_v13 = vadd.f32 %v1547_v62, %v1507_v10 }
 0x1c3   :  { %v1549_v63 = vpop.f32.mrf.mxu0 }
 0x1c4   :  { %v1550_v15 = vadd.f32 %v1549_v63, %v1509_v12 }
 0x1c5   :  { %v1551_v1 = vpop.f32.mrf.mxu0 }
 0x1c7   :  { %v1552_v3 = vpop.f32.mrf.mxu0 }
 0x1ca   :  { %v1588_v5 = vpop.f32.mrf.mxu1 }
 0x1cb   :  { %v1589_v17 = vadd.f32 %v1588_v5, %v1548_v13 }
 0x1cc   :  { %v1590_v7 = vpop.f32.mrf.mxu1 }
 0x1cd   :  { %v1591_v21 = vadd.f32 %v1590_v7, %v1550_v15 }
 0x1ce   :  { %v1592_v11 = vpop.f32.mrf.mxu1 }
 0x1d0   :  { %v1593_v14 = vpop.f32.mrf.mxu1 }
 0x1d2   :  { %v1629_v18 = vpop.f32.mrf.mxu1 }
 0x1d3   :  { %v1630_v22 = vadd.f32 %v1629_v18, %v1589_v17 }
 0x1d4   :  { %v1631_v23 = vpop.f32.mrf.mxu1 }
 0x1d5   :  { %v1632_v27 = vadd.f32 %v1631_v23, %v1591_v21  ;;  %v1638_v28 = vmax.f32 %v1630_v22, 0.0 }
 0x1d6   :  { %v1633_v29 = vpop.f32.mrf.mxu1 }
 0x1d7   :  { %v1639_v30 = vmax.f32 %v1632_v27, 0.0  ;;  %v1642_v9 = vpack.c.bf16 %v1638_v28, %v1638_v28 }
 0x1d8   :  { %v1634_v32 = vpop.f32.mrf.mxu1 }
 0x1d9   :  { %v1643_v34 = vpack.c.bf16 %v1639_v30, %v1639_v30 }
 0x1db   :  { %2113 = vmatprep.mubr.bf16.mxu1 %v1643_v34 }
 0x1dc   :  { %2114 = vmatmul.mubr.bf16.vlgmr.msra.gmra.mxu1 %v1642_v9 }
 0x24d   :  { %v2074_v45 = vpop.f32.mrf.mxu0 }
 0x24e   :  { %v2075_v51 = vadd.f32 %v2074_v45, %v1713_v49 }
 0x24f   :  { %v2076_v19 = vpop.f32.mrf.mxu0 }
 0x250   :  { %v2077_v54 = vadd.f32 %v2076_v19, %v1717_v50 }
 0x251   :  { %v2078_v46 = vpop.f32.mrf.mxu0 }
 0x253   :  { %v2079_v47 = vpop.f32.mrf.mxu0 }
 0x29c   :  { %v2115_v53 = vpop.f32.mrf.mxu1 }
 0x29d   :  { %v2116_v55 = vadd.f32 %v2115_v53, %v2075_v51 }
 0x29e   :  { %v2117_v56 = vpop.f32.mrf.mxu1 }
 0x29f   :  { %v2118_v57 = vadd.f32 %v2117_v56, %v2077_v54  ;;  %v2122_v58 = vmax.f32 %v2116_v55, 0.0 }
 0x2a0   :  { %v2119_v59 = vpop.f32.mrf.mxu1 }
 0x2a1   :  { %v2123_v60 = vmax.f32 %v2118_v57, 0.0  ;;  %v2124_v63 = vpack.c.bf16 %v2122_v58, %v2122_v58 }
 0x2a2   :  { %v2120_v61 = vpop.f32.mrf.mxu1 }
 0x2a3   :  { %v2125_v62 = vpack.c.bf16 %v2123_v60, %v2123_v60 }
 0x2a5   :  { %2293 = vmatprep.mubr.bf16.mxu0 %v2125_v62 }
 0x2a6   :  { %2294 = vmatmul.mubr.bf16.vlgmr.msra.gmra.mxu0 %v2124_v63 }
 0x366   :  { %v2614_v0 = vpop.f32.mrf.mxu0 }
 0x368   :  { %v2615_v20 = vpop.f32.mrf.mxu0 }
 0x369   :  { %v2616_v16 = vadd.f32 %v2615_v20, %v2614_v0 }
 0x36a   :  { %v2617_v1 = vpop.f32.mrf.mxu0 }
 0x36b   :  { %v2296_v2 = vadd.f32 %v2616_v16, %v2581_v40 }
 0x36c   :  { %v2618_v3 = vpop.f32.mrf.mxu0 }
 0x36d   :  { %2301 = vst [vmem:[#allocation11] sm:$0xff] %v2296_v2 }
 0x36e   :  { %3150 = shalt.err (!%p3147_p1)
}
 0x36f   :  { %2311 = dma.vmem_to_hbm [thread:$0]  %s2309_s8, 128, %s3297_s7, [#allocation4]  }
 0x370   :  { %3165 = dma.done.wait [#allocation4], 128  }
 0x371   :  { %3166 = vsyncadd [#allocation4], 4294967168 }
 0x372   :  { %2315 = vsyncpa [#allocation3], 1 }
 0x373   :  { %2316 = vsyncpa [#allocation6], 1 }
 0x374   :  { %2317 = vsyncpa [#allocation9], 1 }
 0x375   :  { %2318 = vsyncpa [#allocation4], 1 }

</bundles_post_ra>
